<compile_context>
chip_gen: v6e
topology: v6e:2x2x1
jax: 0.10.0
libtpu: 0.0.40
codegen_flags: <defaults>
</compile_context>

<pallas_src>
import math

import jax
import jax.numpy as jnp
from jax.experimental import pallas as pl
from jax.experimental.pallas import tpu as pltpu


def _beam_decoder_kernel(
    # inputs
    xh_ref, enc_ref, maskc_ref, maskf_ref,
    wg_ref, bg_ref, w1q_ref, b1q_ref, w2t_ref, b2_ref, w3a_ref, w3b_ref, b3_ref,
    # outputs
    result_ref, hidden_ref, attn_ref, newmask_ref, score_ref, sent_ref,
    # scratch
    out_sc, q_sc, qb_sc, m_sc, l_sc, pooled_sc, idx_sc,
):
    f32 = jnp.float32
    bB, bS, H = enc_ref.shape
    S = maskf_ref.shape[-1]
    s_idx = pl.program_id(1)
    n_s = pl.num_programs(1)

    # ---------------- prologue (once per B-block): GRU step + query projection ----------------
    @pl.when(s_idx == 0)
    def _init():
        xh = xh_ref[...]                                               # (bB, 2H) f32 = [x | h]
        h = xh[:, H:]
        # fused single-step GRU: [x|h] @ wg -> [r_pre | z_pre | i_n | h_n]
        g = jnp.dot(xh, wg_ref[...], preferred_element_type=f32) + bg_ref[...]
        r = jax.nn.sigmoid(g[:, 0:H])
        z = jax.nn.sigmoid(g[:, H:2 * H])
        n = jnp.tanh(g[:, 2 * H:3 * H] + r * g[:, 3 * H:4 * H])
        out = (1.0 - z) * n + z * h                                    # GRU output == new hidden
        out_sc[...] = out
        # dense1 moved to the query side (1/sqrt(H) folded into w1q / b1q)
        q_sc[...] = jnp.dot(out, w1q_ref[...], preferred_element_type=f32)
        qb_sc[...] = jnp.sum(out * b1q_ref[...], axis=-1, keepdims=True)
        # online-softmax / argmax / pooled-encoder state
        m_sc[...] = jnp.full(m_sc.shape, -1e30, f32)
        l_sc[...] = jnp.zeros(l_sc.shape, f32)
        pooled_sc[...] = jnp.zeros(pooled_sc.shape, f32)
        idx_sc[...] = jnp.zeros(idx_sc.shape, jnp.int32)

    # ---------------- per S-chunk: masked logits + online softmax / argmax / pooling ----------------
    enc = enc_ref[...]                                                 # (bB, bS, H) f32 (streamed)
    q3 = q_sc[...][:, None, :]                                         # (bB, 1, H)
    # TODO(synk): compare against a VPU broadcast-multiply + XLU lane-reduce form
    # (avoids bB tiny M=1 MXU passes) per chip generation, as suggested for v6e.
    logits = (jnp.einsum('bqh,bsh->bqs', q3, enc,
                         preferred_element_type=f32).reshape(bB, bS)
              + qb_sc[...] + maskc_ref[...])                           # (bB, bS) masked scores
    attn_ref[...] = logits

    m_old = m_sc[...]
    c_max = jnp.max(logits, axis=-1, keepdims=True)                    # (bB, 1)
    m_new = jnp.maximum(m_old, c_max)
    alpha = jnp.exp(m_old - m_new)
    p = jnp.exp(logits - m_new)                                        # (bB, bS)
    l_sc[...] = alpha * l_sc[...] + jnp.sum(p, axis=-1, keepdims=True)
    pooled_c = jnp.einsum('bqs,bsh->bqh', p[:, None, :], enc,
                          preferred_element_type=f32).reshape(bB, H)
    pooled_sc[...] = alpha * pooled_sc[...] + pooled_c
    m_sc[...] = m_new
    # running lowest-index argmax of the masked logits (== argmax of the softmax)
    iota = jax.lax.broadcasted_iota(jnp.int32, logits.shape, 1) + s_idx * bS
    c_idx = jnp.min(jnp.where(logits == c_max, iota, S), axis=-1, keepdims=True)
    idx_sc[...] = jnp.where(c_max > m_old, c_idx, idx_sc[...])

    # ---------------- epilogue (once per B-block): context, dense3, scores, new mask ----------------
    @pl.when(s_idx == n_s - 1)
    def _fin():
        out = out_sc[...]
        # dense2 moved to the pooled side: ctx = (sum_s align*enc) @ w2.T + b2
        pooled = pooled_sc[...] * pl.reciprocal(l_sc[...], approx=True)
        ctx = jnp.dot(pooled, w2t_ref[...], preferred_element_type=f32) + b2_ref[...]
        # dense3 on cat([ctx, out], -1) via pre-split weight halves
        result_ref[...] = (jnp.dot(ctx, w3a_ref[...], preferred_element_type=f32)
                           + jnp.dot(out, w3b_ref[...], preferred_element_type=f32)
                           + b3_ref[...])
        hidden_ref[...] = out
        # exact top-1 probability (this feeds the returned beam score -> no approx recip)
        score = 1.0 / l_sc[...]                                        # exp(max - max) / sum(exp)
        score_ref[...] = jnp.broadcast_to(score, score_ref.shape)
        sent_ref[...] = jnp.broadcast_to(idx_sc[...], sent_ref.shape)
        # attention_mask[b, idx[b]] = -1e10
        full_iota = jax.lax.broadcasted_iota(jnp.int32, newmask_ref.shape, 1)
        newmask_ref[...] = jnp.where(full_iota == idx_sc[...],
                                     jnp.float32(-10000000000.0), maskf_ref[...])


class BeamSearchAttentionDecoderPallas:
    """JAX/Pallas port of the PyTorch BeamSearchAttentionDecoder (topk == 1)."""

    def __init__(self, hidden_size, num_sent, topk=1, key=None):
        assert topk == 1, "only topk=1 supported in this synthetic kernel"
        self.hidden_size = hidden_size
        self.num_sent = num_sent
        self.topk = topk
        self.div_term = math.sqrt(hidden_size)

        if key is None:
            key = jax.random.PRNGKey(0)
        ks = jax.random.split(key, 10)
        H = hidden_size
        s = 1.0 / math.sqrt(H)
        u = lambda k, shape: jax.random.uniform(k, shape, jnp.float32, -s, s)
        # PyTorch-layout parameters (Linear: (out, in); GRU: (3H, H)/(3H,), gates r,z,n).
        self.w1 = u(ks[0], (H, H));        self.b1 = u(ks[1], (1, H))
        self.w2 = u(ks[2], (H, H));        self.b2 = u(ks[3], (1, H))
        self.w3 = u(ks[4], (H, 2 * H));    self.b3 = u(ks[5], (1, H))
        self.w_ih = u(ks[6], (3 * H, H));  self.b_ih = u(ks[7], (1, 3 * H))
        self.w_hh = u(ks[8], (3 * H, H));  self.b_hh = u(ks[9], (1, 3 * H))

        # ---- kernel-layout parameters ----
        inv_div = 1.0 / self.div_term
        # dense1 moved to the query side: q = out @ w1q, qb = <out, b1q>   (no transpose!)
        self.w1q = self.w1 * inv_div                     # (H, H)
        self.b1q = self.b1 * inv_div                     # (1, H)
        # dense2 moved to the pooled-context side: ctx = pooled @ w2.T + b2
        self.w2t = self.w2.T                             # (H, H)
        # dense3 split into the two halves of cat([context, out], -1)
        self.w3a_t = self.w3[:, :H].T                    # (H, H)
        self.w3b_t = self.w3[:, H:].T                    # (H, H)
        # fused single-step GRU weight: [x|h] @ wg -> [i_r+h_r | i_z+h_z | i_n | h_n]
        wih_t = self.w_ih.T                              # (H, 3H)
        whh_t = self.w_hh.T                              # (H, 3H)
        wg = jnp.zeros((2 * H, 4 * H), jnp.float32)
        wg = wg.at[:H, 0:2 * H].set(wih_t[:, 0:2 * H])          # x -> r, z
        wg = wg.at[H:, 0:2 * H].set(whh_t[:, 0:2 * H])          # h -> r, z
        wg = wg.at[:H, 2 * H:3 * H].set(wih_t[:, 2 * H:3 * H])  # x -> i_n
        wg = wg.at[H:, 3 * H:4 * H].set(whh_t[:, 2 * H:3 * H])  # h -> h_n
        self.wg = wg                                     # (2H, 4H)
        self.bg = jnp.concatenate(
            [self.b_ih[:, 0:2 * H] + self.b_hh[:, 0:2 * H],
             self.b_ih[:, 2 * H:3 * H], self.b_hh[:, 2 * H:3 * H]], axis=1)  # (1, 4H)

        # jit the whole first-step forward so surrounding ops fuse and the
        # pallas_call is dispatched once per decode step.
        self._forward = jax.jit(self._first_step)

    # ------------------------------------------------------------------ #
    def _first_step(self, last_hidden, decoder_inputs, encoder_outputs, attention_mask):
        B, S, H = encoder_outputs.shape
        x2 = decoder_inputs.reshape(B, H).astype(jnp.float32)
        h2 = last_hidden.reshape(B, H).astype(jnp.float32)
        xh = jnp.concatenate([x2, h2], axis=-1)                    # (B, 2H) f32
        enc = encoder_outputs.astype(jnp.float32)                  # (B, S, H) f32 (no bf16 copy pass)
        mask2 = attention_mask.reshape(B, S).astype(jnp.float32)   # lane-dense (B, S)

        # ---- block sizes: B-blocks ("parallel" -> megacore) x S-chunks ("arbitrary") ----
        bB = 8 if (B >= 8 and B % 8 == 0) else B
        if S > 512 and S % 512 == 0:
            bS = 512
        elif S > 256 and S % 256 == 0:
            bS = 256
        else:
            bS = S   # TODO(synk): ragged / non-multiple S would need a padded chunk
        grid = (B // bB, S // bS)

        def _resident(arr):
            nd = arr.ndim
            return pl.BlockSpec(arr.shape, lambda b, s, _nd=nd: (0,) * _nd)

        weights = (self.wg, self.bg, self.w1q, self.b1q, self.w2t, self.b2,
                   self.w3a_t, self.w3b_t, self.b3)

        in_specs = [
            pl.BlockSpec((bB, 2 * H), lambda b, s: (b, 0)),        # xh
            pl.BlockSpec((bB, bS, H), lambda b, s: (b, s, 0)),     # enc chunk (streamed)
            pl.BlockSpec((bB, bS), lambda b, s: (b, s)),           # mask chunk
            pl.BlockSpec((bB, S), lambda b, s: (b, 0)),            # mask full row (for the update)
        ] + [_resident(w) for w in weights]

        out_shape = (
            jax.ShapeDtypeStruct((B, H), jnp.float32),     # result
            jax.ShapeDtypeStruct((B, H), jnp.float32),     # new hidden (GRU output)
            jax.ShapeDtypeStruct((B, S), jnp.float32),     # masked attention logits
            jax.ShapeDtypeStruct((B, S), jnp.float32),     # updated attention mask
            jax.ShapeDtypeStruct((B, 128), jnp.float32),   # top-1 softmax prob (lane 0)
            jax.ShapeDtypeStruct((B, 128), jnp.int32),     # top-1 sentence index (lane 0)
        )
        out_specs = (
            pl.BlockSpec((bB, H), lambda b, s: (b, 0)),
            pl.BlockSpec((bB, H), lambda b, s: (b, 0)),
            pl.BlockSpec((bB, bS), lambda b, s: (b, s)),
            pl.BlockSpec((bB, S), lambda b, s: (b, 0)),
            pl.BlockSpec((bB, 128), lambda b, s: (b, 0)),
            pl.BlockSpec((bB, 128), lambda b, s: (b, 0)),
        )
        scratch_shapes = [
            pltpu.VMEM((bB, H), jnp.float32),   # GRU output
            pltpu.VMEM((bB, H), jnp.float32),   # projected query
            pltpu.VMEM((bB, 1), jnp.float32),   # query-side bias scalar
            pltpu.VMEM((bB, 1), jnp.float32),   # running softmax max
            pltpu.VMEM((bB, 1), jnp.float32),   # running softmax denom
            pltpu.VMEM((bB, H), jnp.float32),   # running exp-weighted encoder sum
            pltpu.VMEM((bB, 1), jnp.int32),     # running argmax index
        ]

        # ---- derive the VMEM budget from the block shapes (headroom below 64 MiB on v7x) ----
        blk = 0
        blk += 2 * (bB * 2 * H + bB * bS * H + bB * bS + bB * S) * 4            # inputs (x2 buffers)
        blk += 2 * sum(int(w.size) * w.dtype.itemsize for w in weights)         # resident weights
        blk += 2 * (2 * bB * H + bB * bS + bB * S + 2 * bB * 128) * 4           # outputs (x2 buffers)
        blk += (3 * bB * H + 4 * bB) * 4                                        # scratch
        vmem_limit = int(min(max(2 * blk, 32 * 1024 * 1024), 56 * 1024 * 1024))

        outs = pl.pallas_call(
            _beam_decoder_kernel,
            out_shape=out_shape,
            grid=grid,
            in_specs=in_specs,
            out_specs=out_specs,
            scratch_shapes=scratch_shapes,
            compiler_params=pltpu.CompilerParams(
                dimension_semantics=("parallel", "arbitrary"),
                vmem_limit_bytes=vmem_limit),
        )(xh, enc, mask2, mask2, *weights)

        result2, hidden2, attn2, newmask2, score2, sent2 = outs
        nb = B // self.topk
        result = result2.reshape(B, 1, H)
        hidden = hidden2.reshape(1, B, H)
        attention_scores = attn2.reshape(1, B, 1, S)
        attention_mask_out = newmask2.reshape(B, 1, S)
        evidence_scores = -jnp.log(score2[:nb, 0])
        evidence_sentences = sent2[:nb, 0]
        return (result, hidden, evidence_sentences, attention_scores,
                attention_mask_out, evidence_scores)

    # ------------------------------------------------------------------ #
    def __call__(self, last_hidden, decoder_inputs, encoder_outputs,
                 attention_scores, attention_mask,
                 evidence_scores=None, evidence_sentence_index=None):
        if evidence_scores is not None:
            # TODO(synk): the beam re-scoring branch does host-side Python list
            # sorting / .tolist() bookkeeping with no clean Pallas equivalent.
            raise NotImplementedError("only the evidence_scores=None branch is implemented")
        (result, hidden, evidence_sentences, attention_scores_out,
         attention_mask_out, evidence_scores_out) = self._forward(
            last_hidden, decoder_inputs, encoder_outputs, attention_mask)
        # TODO(synk): the original returns a Python list of [int]; kept as a device
        # array to avoid a per-step device->host sync (callers can .tolist()).
        evidence_sentence_index = evidence_sentences.reshape(-1, 1)
        return (result, hidden, evidence_sentence_index, attention_scores_out,
                attention_mask_out, evidence_scores_out)


def _reference_forward(mod, last_hidden, decoder_inputs, encoder_outputs, attention_mask):
    """Pure-JAX f32 reference of the same branch, for sanity checking."""
    B, S, H = encoder_outputs.shape
    key = encoder_outputs @ mod.w1.T + mod.b1
    val = encoder_outputs @ mod.w2.T + mod.b2
    x = decoder_inputs.reshape(B, H)
    h = last_hidden.reshape(B, H)
    gi = x @ mod.w_ih.T + mod.b_ih
    gh = h @ mod.w_hh.T + mod.b_hh
    r = jax.nn.sigmoid(gi[:, :H] + gh[:, :H])
    z = jax.nn.sigmoid(gi[:, H:2 * H] + gh[:, H:2 * H])
    n = jnp.tanh(gi[:, 2 * H:] + r * gh[:, 2 * H:])
    out = (1 - z) * n + z * h
    attn = jnp.einsum('bh,bsh->bs', out, key) / mod.div_term + attention_mask.reshape(B, S)
    align = jax.nn.softmax(attn, -1)
    ctx = jnp.einsum('bs,bsh->bh', align, val)
    result = jnp.concatenate([ctx, out], -1) @ mod.w3.T + mod.b3
    return result, out, attn


if __name__ == "__main__":
    B, S, H = 2, 8, 128   # batch (beams), num_sent, hidden (lane-aligned H)
    mod = BeamSearchAttentionDecoderPallas(hidden_size=H, num_sent=S, topk=1,
                                           key=jax.random.PRNGKey(0))

    kin = jax.random.split(jax.random.PRNGKey(0), 3)
    last_hidden = jax.random.normal(kin[0], (1, B, H), jnp.float32)
    decoder_inputs = jax.random.normal(kin[1], (B, 1, H), jnp.float32)
    encoder_outputs = jax.random.normal(kin[2], (B, S, H), jnp.float32)
    attention_mask = jnp.zeros((B, 1, S), jnp.float32)
    attention_scores = None  # unused in the evidence_scores=None branch

    ref_result, ref_out, ref_attn = _reference_forward(
        mod, last_hidden, decoder_inputs, encoder_outputs, attention_mask)

    (result, hidden, evidence_sentence_index, attention_scores_out,
     attention_mask_out, evidence_scores_out) = mod(
        last_hidden, decoder_inputs, encoder_outputs, attention_scores, attention_mask)

    jax.block_until_ready((result, hidden, evidence_sentence_index,
                           attention_scores_out, attention_mask_out,
                           evidence_scores_out))

    # --- checks against a pure-JAX f32 reference (MXU default precision -> loose tol) ---
    assert jnp.allclose(result.reshape(B, H), ref_result, atol=5e-2, rtol=5e-2)
    assert jnp.allclose(hidden.reshape(B, H), ref_out, atol=5e-2, rtol=5e-2)
    k_attn = attention_scores_out.reshape(B, S)
    assert jnp.allclose(k_attn, ref_attn, atol=5e-2, rtol=5e-2)
    # beam score / index / mask self-consistency against the returned masked logits
    k_align = jax.nn.softmax(k_attn, -1)
    assert jnp.allclose(evidence_scores_out, -jnp.log(jnp.max(k_align, -1)),
                        atol=2e-3, rtol=2e-3)
    idx = evidence_sentence_index.reshape(-1)
    assert jnp.array_equal(idx, jnp.argmax(k_attn, -1).astype(jnp.int32))
    exp_mask = jnp.zeros((B, S), jnp.float32).at[jnp.arange(B), idx].set(-10000000000.0)
    assert jnp.allclose(attention_mask_out.reshape(B, S), exp_mask)

    print("KERNEL_OK")
</pallas_src>

<mosaic_0001>
module attributes {stable_mosaic.version = 11 : i64} {
  func.func @_beam_decoder_kernel(%arg0: i32, %arg1: i32, %arg2: memref<2x256xf32, #tpu.memory_space<vmem>>, %arg3: memref<2x8x128xf32, #tpu.memory_space<vmem>>, %arg4: memref<2x8xf32, #tpu.memory_space<vmem>>, %arg5: memref<2x8xf32, #tpu.memory_space<vmem>>, %arg6: memref<256x512xf32, #tpu.memory_space<vmem>>, %arg7: memref<1x512xf32, #tpu.memory_space<vmem>>, %arg8: memref<128x128xf32, #tpu.memory_space<vmem>>, %arg9: memref<1x128xf32, #tpu.memory_space<vmem>>, %arg10: memref<128x128xf32, #tpu.memory_space<vmem>>, %arg11: memref<1x128xf32, #tpu.memory_space<vmem>>, %arg12: memref<128x128xf32, #tpu.memory_space<vmem>>, %arg13: memref<128x128xf32, #tpu.memory_space<vmem>>, %arg14: memref<1x128xf32, #tpu.memory_space<vmem>>, %arg15: memref<2x128xf32, #tpu.memory_space<vmem>>, %arg16: memref<2x128xf32, #tpu.memory_space<vmem>>, %arg17: memref<2x8xf32, #tpu.memory_space<vmem>>, %arg18: memref<2x8xf32, #tpu.memory_space<vmem>>, %arg19: memref<2x128xf32, #tpu.memory_space<vmem>>, %arg20: memref<2x128xi32, #tpu.memory_space<vmem>>, %arg21: memref<2x128xf32, #tpu.memory_space<vmem>>, %arg22: memref<2x128xf32, #tpu.memory_space<vmem>>, %arg23: memref<2x1xf32, #tpu.memory_space<vmem>>, %arg24: memref<2x1xf32, #tpu.memory_space<vmem>>, %arg25: memref<2x1xf32, #tpu.memory_space<vmem>>, %arg26: memref<2x128xf32, #tpu.memory_space<vmem>>, %arg27: memref<2x1xi32, #tpu.memory_space<vmem>>) attributes {dimension_semantics = [#tpu.dimension_semantics<parallel>, #tpu.dimension_semantics<arbitrary>], iteration_bounds = array<i64: 1, 1>, scalar_prefetch = 0 : i64, scratch_operands = 7 : i64, tpu.core_type = #tpu.core_type<tc>, window_params = [{transform_indices = @transform_0, window_bounds = array<i64: 2, 256>}, {transform_indices = @transform_1, window_bounds = array<i64: 2, 8, 128>}, {transform_indices = @transform_2, window_bounds = array<i64: 2, 8>}, {transform_indices = @transform_3, window_bounds = array<i64: 2, 8>}, {pipeline_mode = #tpu.pipeline_mode<synchronous>, transform_indices = @transform_4, window_bounds = array<i64: 256, 512>}, {pipeline_mode = #tpu.pipeline_mode<synchronous>, transform_indices = @transform_5, window_bounds = array<i64: 1, 512>}, {pipeline_mode = #tpu.pipeline_mode<synchronous>, transform_indices = @transform_6, window_bounds = array<i64: 128, 128>}, {pipeline_mode = #tpu.pipeline_mode<synchronous>, transform_indices = @transform_7, window_bounds = array<i64: 1, 128>}, {pipeline_mode = #tpu.pipeline_mode<synchronous>, transform_indices = @transform_8, window_bounds = array<i64: 128, 128>}, {pipeline_mode = #tpu.pipeline_mode<synchronous>, transform_indices = @transform_9, window_bounds = array<i64: 1, 128>}, {pipeline_mode = #tpu.pipeline_mode<synchronous>, transform_indices = @transform_10, window_bounds = array<i64: 128, 128>}, {pipeline_mode = #tpu.pipeline_mode<synchronous>, transform_indices = @transform_11, window_bounds = array<i64: 128, 128>}, {pipeline_mode = #tpu.pipeline_mode<synchronous>, transform_indices = @transform_12, window_bounds = array<i64: 1, 128>}, {transform_indices = @transform_13, window_bounds = array<i64: 2, 128>}, {transform_indices = @transform_14, window_bounds = array<i64: 2, 128>}, {transform_indices = @transform_15, window_bounds = array<i64: 2, 8>}, {transform_indices = @transform_16, window_bounds = array<i64: 2, 8>}, {transform_indices = @transform_17, window_bounds = array<i64: 2, 128>}, {transform_indices = @transform_18, window_bounds = array<i64: 2, 128>}]} {
    %c0_i32 = arith.constant 0 : i32
    %0 = arith.cmpi eq, %arg1, %c0_i32 : i32
    %1 = arith.extui %0 : i1 to i32
    %c0_i32_0 = arith.constant 0 : i32
    %2 = arith.cmpi ne, %1, %c0_i32_0 : i32
    scf.if %2 {
      %c0_34 = arith.constant 0 : index
      %c0_35 = arith.constant 0 : index
      %55 = vector.load %arg2[%c0_34, %c0_35] : memref<2x256xf32, #tpu.memory_space<vmem>>, vector<2x256xf32>
      %56 = vector.extract_strided_slice %55 {offsets = [0, 128], sizes = [2, 128], strides = [1, 1]} : vector<2x256xf32> to vector<2x128xf32>
      %c0_36 = arith.constant 0 : index
      %c0_37 = arith.constant 0 : index
      %57 = vector.load %arg6[%c0_36, %c0_37] : memref<256x512xf32, #tpu.memory_space<vmem>>, vector<256x512xf32>
      %cst_38 = arith.constant dense<0.000000e+00> : vector<2x512xf32>
      %58 = tpu.matmul %55, %57, %cst_38 {dimension_numbers = #tpu.dot_dimension_numbers<[1], [0], [0], [1], [0, 0, 1, 1], [], []>} : vector<2x256xf32>, vector<256x512xf32>, vector<2x512xf32> -> vector<2x512xf32>
      %c0_39 = arith.constant 0 : index
      %c0_40 = arith.constant 0 : index
      %59 = vector.load %arg7[%c0_39, %c0_40] : memref<1x512xf32, #tpu.memory_space<vmem>>, vector<1x512xf32>
      %60 = vector.broadcast %59 : vector<1x512xf32> to vector<2x512xf32>
      %61 = arith.addf %58, %60 : vector<2x512xf32>
      %62 = vector.extract_strided_slice %61 {offsets = [0, 0], sizes = [2, 128], strides = [1, 1]} : vector<2x512xf32> to vector<2x128xf32>
      %63 = arith.negf %62 : vector<2x128xf32>
      %64 = math.exp %63 : vector<2x128xf32>
      %cst_41 = arith.constant 1.000000e+00 : f32
      %65 = vector.broadcast %cst_41 : f32 to vector<2x128xf32>
      %66 = arith.addf %65, %64 : vector<2x128xf32>
      %67 = arith.divf %65, %66 : vector<2x128xf32>
      %68 = vector.extract_strided_slice %61 {offsets = [0, 128], sizes = [2, 128], strides = [1, 1]} : vector<2x512xf32> to vector<2x128xf32>
      %69 = arith.negf %68 : vector<2x128xf32>
      %70 = math.exp %69 : vector<2x128xf32>
      %cst_42 = arith.constant 1.000000e+00 : f32
      %71 = vector.broadcast %cst_42 : f32 to vector<2x128xf32>
      %72 = arith.addf %71, %70 : vector<2x128xf32>
      %73 = arith.divf %71, %72 : vector<2x128xf32>
      %74 = vector.extract_strided_slice %61 {offsets = [0, 256], sizes = [2, 128], strides = [1, 1]} : vector<2x512xf32> to vector<2x128xf32>
      %75 = vector.extract_strided_slice %61 {offsets = [0, 384], sizes = [2, 128], strides = [1, 1]} : vector<2x512xf32> to vector<2x128xf32>
      %76 = arith.mulf %67, %75 : vector<2x128xf32>
      %77 = arith.addf %74, %76 : vector<2x128xf32>
      %78 = math.tanh %77 : vector<2x128xf32>
      %cst_43 = arith.constant 1.000000e+00 : f32
      %79 = vector.broadcast %cst_43 : f32 to vector<2x128xf32>
      %80 = arith.subf %79, %73 : vector<2x128xf32>
      %81 = arith.mulf %80, %78 : vector<2x128xf32>
      %82 = arith.mulf %73, %56 : vector<2x128xf32>
      %83 = arith.addf %81, %82 : vector<2x128xf32>
      %c0_44 = arith.constant 0 : index
      %c0_45 = arith.constant 0 : index
      %84 = vector.load %arg21[%c0_44, %c0_45] : memref<2x128xf32, #tpu.memory_space<vmem>>, vector<2x128xf32>
      tpu.vector_store %arg21[%c0_44, %c0_45], %83 {strides = array<i32>} : memref<2x128xf32, #tpu.memory_space<vmem>>, vector<2x128xf32>,
      %c0_46 = arith.constant 0 : index
      %c0_47 = arith.constant 0 : index
      %85 = vector.load %arg8[%c0_46, %c0_47] : memref<128x128xf32, #tpu.memory_space<vmem>>, vector<128x128xf32>
      %cst_48 = arith.constant dense<0.000000e+00> : vector<2x128xf32>
      %86 = tpu.matmul %83, %85, %cst_48 {dimension_numbers = #tpu.dot_dimension_numbers<[1], [0], [0], [1], [0, 0, 1, 1], [], []>} : vector<2x128xf32>, vector<128x128xf32>, vector<2x128xf32> -> vector<2x128xf32>
      %c0_49 = arith.constant 0 : index
      %c0_50 = arith.constant 0 : index
      %87 = vector.load %arg22[%c0_49, %c0_50] : memref<2x128xf32, #tpu.memory_space<vmem>>, vector<2x128xf32>
      tpu.vector_store %arg22[%c0_49, %c0_50], %86 {strides = array<i32>} : memref<2x128xf32, #tpu.memory_space<vmem>>, vector<2x128xf32>,
      %c0_51 = arith.constant 0 : index
      %c0_52 = arith.constant 0 : index
      %88 = vector.load %arg9[%c0_51, %c0_52] : memref<1x128xf32, #tpu.memory_space<vmem>>, vector<1x128xf32>
      %89 = vector.broadcast %88 : vector<1x128xf32> to vector<2x128xf32>
      %90 = arith.mulf %83, %89 : vector<2x128xf32>
      %cst_53 = arith.constant dense<0.000000e+00> : vector<2xf32>
      %91 = vector.multi_reduction <add>, %90, %cst_53 [1] : vector<2x128xf32> to vector<2xf32>
      %92 = vector.shape_cast %91 : vector<2xf32> to vector<2x1xf32>
      %c0_54 = arith.constant 0 : index
      %c0_55 = arith.constant 0 : index
      %93 = vector.load %arg23[%c0_54, %c0_55] : memref<2x1xf32, #tpu.memory_space<vmem>>, vector<2x1xf32>
      tpu.vector_store %arg23[%c0_54, %c0_55], %92 {strides = array<i32>} : memref<2x1xf32, #tpu.memory_space<vmem>>, vector<2x1xf32>,
      %cst_56 = arith.constant -1.000000e+30 : f32
      %94 = vector.broadcast %cst_56 : f32 to vector<2x1xf32>
      %c0_57 = arith.constant 0 : index
      %c0_58 = arith.constant 0 : index
      %95 = vector.load %arg24[%c0_57, %c0_58] : memref<2x1xf32, #tpu.memory_space<vmem>>, vector<2x1xf32>
      tpu.vector_store %arg24[%c0_57, %c0_58], %94 {strides = array<i32>} : memref<2x1xf32, #tpu.memory_space<vmem>>, vector<2x1xf32>,
      %cst_59 = arith.constant 0.000000e+00 : f32
      %96 = vector.broadcast %cst_59 : f32 to vector<2x1xf32>
      %c0_60 = arith.constant 0 : index
      %c0_61 = arith.constant 0 : index
      %97 = vector.load %arg25[%c0_60, %c0_61] : memref<2x1xf32, #tpu.memory_space<vmem>>, vector<2x1xf32>
      tpu.vector_store %arg25[%c0_60, %c0_61], %96 {strides = array<i32>} : memref<2x1xf32, #tpu.memory_space<vmem>>, vector<2x1xf32>,
      %cst_62 = arith.constant 0.000000e+00 : f32
      %98 = vector.broadcast %cst_62 : f32 to vector<2x128xf32>
      %c0_63 = arith.constant 0 : index
      %c0_64 = arith.constant 0 : index
      %99 = vector.load %arg26[%c0_63, %c0_64] : memref<2x128xf32, #tpu.memory_space<vmem>>, vector<2x128xf32>
      tpu.vector_store %arg26[%c0_63, %c0_64], %98 {strides = array<i32>} : memref<2x128xf32, #tpu.memory_space<vmem>>, vector<2x128xf32>,
      %c0_i32_65 = arith.constant 0 : i32
      %100 = vector.broadcast %c0_i32_65 : i32 to vector<2x1xi32>
      %c0_66 = arith.constant 0 : index
      %c0_67 = arith.constant 0 : index
      %101 = vector.load %arg27[%c0_66, %c0_67] : memref<2x1xi32, #tpu.memory_space<vmem>>, vector<2x1xi32>
      tpu.vector_store %arg27[%c0_66, %c0_67], %100 {strides = array<i32>} : memref<2x1xi32, #tpu.memory_space<vmem>>, vector<2x1xi32>,
    } else {
    }
    %c0 = arith.constant 0 : index
    %c0_1 = arith.constant 0 : index
    %c0_2 = arith.constant 0 : index
    %3 = vector.load %arg3[%c0, %c0_1, %c0_2] : memref<2x8x128xf32, #tpu.memory_space<vmem>>, vector<2x8x128xf32>
    %c0_3 = arith.constant 0 : index
    %c0_4 = arith.constant 0 : index
    %4 = vector.load %arg22[%c0_3, %c0_4] : memref<2x128xf32, #tpu.memory_space<vmem>>, vector<2x128xf32>
    %5 = vector.shape_cast %4 : vector<2x128xf32> to vector<2x1x128xf32>
    "tpu.trace_start"() <{level = 10 : i32, message = "bqh,bsh->bqs"}> : () -> ()
    %cst = arith.constant dense<0.000000e+00> : vector<2x1x8xf32>
    %6 = tpu.matmul %5, %3, %cst {dimension_numbers = #tpu.dot_dimension_numbers<[2], [2], [1], [1], [0, 0, 0, 1, 1, 1], [0], [0]>} : vector<2x1x128xf32>, vector<2x8x128xf32>, vector<2x1x8xf32> -> vector<2x1x8xf32>
    "tpu.trace_stop"() : () -> ()
    %7 = vector.shape_cast %6 : vector<2x1x8xf32> to vector<2x8xf32>
    %c0_5 = arith.constant 0 : index
    %c0_6 = arith.constant 0 : index
    %8 = vector.load %arg23[%c0_5, %c0_6] : memref<2x1xf32, #tpu.memory_space<vmem>>, vector<2x1xf32>
    %9 = vector.broadcast %8 : vector<2x1xf32> to vector<2x8xf32>
    %10 = arith.addf %7, %9 : vector<2x8xf32>
    %c0_7 = arith.constant 0 : index
    %c0_8 = arith.constant 0 : index
    %11 = vector.load %arg4[%c0_7, %c0_8] : memref<2x8xf32, #tpu.memory_space<vmem>>, vector<2x8xf32>
    %12 = arith.addf %10, %11 : vector<2x8xf32>
    %c0_9 = arith.constant 0 : index
    %c0_10 = arith.constant 0 : index
    %13 = vector.load %arg17[%c0_9, %c0_10] : memref<2x8xf32, #tpu.memory_space<vmem>>, vector<2x8xf32>
    tpu.vector_store %arg17[%c0_9, %c0_10], %12 {strides = array<i32>} : memref<2x8xf32, #tpu.memory_space<vmem>>, vector<2x8xf32>,
    %c0_11 = arith.constant 0 : index
    %c0_12 = arith.constant 0 : index
    %14 = vector.load %arg24[%c0_11, %c0_12] : memref<2x1xf32, #tpu.memory_space<vmem>>, vector<2x1xf32>
    %cst_13 = arith.constant dense<0xFF800000> : vector<2xf32>
    %15 = vector.multi_reduction <maximumf>, %12, %cst_13 [1] : vector<2x8xf32> to vector<2xf32>
    %16 = vector.shape_cast %15 : vector<2xf32> to vector<2x1xf32>
    %17 = arith.maximumf %14, %16 : vector<2x1xf32>
    %18 = arith.subf %14, %17 : vector<2x1xf32>
    %19 = math.exp %18 : vector<2x1xf32>
    %20 = vector.broadcast %17 : vector<2x1xf32> to vector<2x8xf32>
    %21 = arith.subf %12, %20 : vector<2x8xf32>
    %22 = math.exp %21 : vector<2x8xf32>
    %c0_14 = arith.constant 0 : index
    %c0_15 = arith.constant 0 : index
    %23 = vector.load %arg25[%c0_14, %c0_15] : memref<2x1xf32, #tpu.memory_space<vmem>>, vector<2x1xf32>
    %24 = arith.mulf %19, %23 : vector<2x1xf32>
    %cst_16 = arith.constant dense<0.000000e+00> : vector<2xf32>
    %25 = vector.multi_reduction <add>, %22, %cst_16 [1] : vector<2x8xf32> to vector<2xf32>
    %26 = vector.shape_cast %25 : vector<2xf32> to vector<2x1xf32>
    %27 = arith.addf %24, %26 : vector<2x1xf32>
    %c0_17 = arith.constant 0 : index
    %c0_18 = arith.constant 0 : index
    %28 = vector.load %arg25[%c0_17, %c0_18] : memref<2x1xf32, #tpu.memory_space<vmem>>, vector<2x1xf32>
    tpu.vector_store %arg25[%c0_17, %c0_18], %27 {strides = array<i32>} : memref<2x1xf32, #tpu.memory_space<vmem>>, vector<2x1xf32>,
    %29 = vector.shape_cast %22 : vector<2x8xf32> to vector<2x1x8xf32>
    "tpu.trace_start"() <{level = 10 : i32, message = "bqs,bsh->bqh"}> : () -> ()
    %cst_19 = arith.constant dense<0.000000e+00> : vector<2x1x128xf32>
    %30 = tpu.matmul %29, %3, %cst_19 {dimension_numbers = #tpu.dot_dimension_numbers<[2], [1], [1], [2], [0, 0, 0, 1, 1, 2], [0], [0]>} : vector<2x1x8xf32>, vector<2x8x128xf32>, vector<2x1x128xf32> -> vector<2x1x128xf32>
    "tpu.trace_stop"() : () -> ()
    %31 = vector.shape_cast %30 : vector<2x1x128xf32> to vector<2x128xf32>
    %c0_20 = arith.constant 0 : index
    %c0_21 = arith.constant 0 : index
    %32 = vector.load %arg26[%c0_20, %c0_21] : memref<2x128xf32, #tpu.memory_space<vmem>>, vector<2x128xf32>
    %33 = vector.broadcast %19 : vector<2x1xf32> to vector<2x128xf32>
    %34 = arith.mulf %33, %32 : vector<2x128xf32>
    %35 = arith.addf %34, %31 : vector<2x128xf32>
    %c0_22 = arith.constant 0 : index
    %c0_23 = arith.constant 0 : index
    %36 = vector.load %arg26[%c0_22, %c0_23] : memref<2x128xf32, #tpu.memory_space<vmem>>, vector<2x128xf32>
    tpu.vector_store %arg26[%c0_22, %c0_23], %35 {strides = array<i32>} : memref<2x128xf32, #tpu.memory_space<vmem>>, vector<2x128xf32>,
    %c0_24 = arith.constant 0 : index
    %c0_25 = arith.constant 0 : index
    %37 = vector.load %arg24[%c0_24, %c0_25] : memref<2x1xf32, #tpu.memory_space<vmem>>, vector<2x1xf32>
    tpu.vector_store %arg24[%c0_24, %c0_25], %17 {strides = array<i32>} : memref<2x1xf32, #tpu.memory_space<vmem>>, vector<2x1xf32>,
    %38 = tpu.iota {dimensions = array<i32: 1>} : vector<2x8xi32>
    %c8_i32 = arith.constant 8 : i32
    %39 = arith.muli %arg1, %c8_i32 : i32
    %40 = vector.broadcast %39 : i32 to vector<2x8xi32>
    %41 = arith.addi %38, %40 : vector<2x8xi32>
    %42 = vector.broadcast %16 : vector<2x1xf32> to vector<2x8xf32>
    %43 = arith.cmpf oeq, %12, %42 : vector<2x8xf32>
    %c8_i32_26 = arith.constant 8 : i32
    %44 = vector.broadcast %c8_i32_26 : i32 to vector<2x8xi32>
    %45 = arith.select %43, %41, %44 : vector<2x8xi1>, vector<2x8xi32>
    %cst_27 = arith.constant dense<2147483647> : vector<2xi32>
    %46 = vector.multi_reduction <minsi>, %45, %cst_27 [1] : vector<2x8xi32> to vector<2xi32>
    %47 = vector.shape_cast %46 : vector<2xi32> to vector<2x1xi32>
    %48 = arith.cmpf ogt, %16, %14 : vector<2x1xf32>
    %c0_28 = arith.constant 0 : index
    %c0_29 = arith.constant 0 : index
    %49 = vector.load %arg27[%c0_28, %c0_29] : memref<2x1xi32, #tpu.memory_space<vmem>>, vector<2x1xi32>
    %50 = arith.select %48, %47, %49 : vector<2x1xi1>, vector<2x1xi32>
    %c0_30 = arith.constant 0 : index
    %c0_31 = arith.constant 0 : index
    %51 = vector.load %arg27[%c0_30, %c0_31] : memref<2x1xi32, #tpu.memory_space<vmem>>, vector<2x1xi32>
    tpu.vector_store %arg27[%c0_30, %c0_31], %50 {strides = array<i32>} : memref<2x1xi32, #tpu.memory_space<vmem>>, vector<2x1xi32>,
    %c0_i32_32 = arith.constant 0 : i32
    %52 = arith.cmpi eq, %arg1, %c0_i32_32 : i32
    %53 = arith.extui %52 : i1 to i32
    %c0_i32_33 = arith.constant 0 : i32
    %54 = arith.cmpi ne, %53, %c0_i32_33 : i32
    scf.if %54 {
      %c0_34 = arith.constant 0 : index
      %c0_35 = arith.constant 0 : index
      %55 = vector.load %arg21[%c0_34, %c0_35] : memref<2x128xf32, #tpu.memory_space<vmem>>, vector<2x128xf32>
      %c0_36 = arith.constant 0 : index
      %c0_37 = arith.constant 0 : index
      %56 = vector.load %arg26[%c0_36, %c0_37] : memref<2x128xf32, #tpu.memory_space<vmem>>, vector<2x128xf32>
      %c0_38 = arith.constant 0 : index
      %c0_39 = arith.constant 0 : index
      %57 = vector.load %arg25[%c0_38, %c0_39] : memref<2x1xf32, #tpu.memory_space<vmem>>, vector<2x1xf32>
      %58 = tpu.reciprocal %57 {approx = true} : vector<2x1xf32> -> vector<2x1xf32>
      %59 = vector.broadcast %58 : vector<2x1xf32> to vector<2x128xf32>
      %60 = arith.mulf %56, %59 : vector<2x128xf32>
      %c0_40 = arith.constant 0 : index
      %c0_41 = arith.constant 0 : index
      %61 = vector.load %arg10[%c0_40, %c0_41] : memref<128x128xf32, #tpu.memory_space<vmem>>, vector<128x128xf32>
      %cst_42 = arith.constant dense<0.000000e+00> : vector<2x128xf32>
      %62 = tpu.matmul %60, %61, %cst_42 {dimension_numbers = #tpu.dot_dimension_numbers<[1], [0], [0], [1], [0, 0, 1, 1], [], []>} : vector<2x128xf32>, vector<128x128xf32>, vector<2x128xf32> -> vector<2x128xf32>
      %c0_43 = arith.constant 0 : index
      %c0_44 = arith.constant 0 : index
      %63 = vector.load %arg11[%c0_43, %c0_44] : memref<1x128xf32, #tpu.memory_space<vmem>>, vector<1x128xf32>
      %64 = vector.broadcast %63 : vector<1x128xf32> to vector<2x128xf32>
      %65 = arith.addf %62, %64 : vector<2x128xf32>
      %c0_45 = arith.constant 0 : index
      %c0_46 = arith.constant 0 : index
      %66 = vector.load %arg12[%c0_45, %c0_46] : memref<128x128xf32, #tpu.memory_space<vmem>>, vector<128x128xf32>
      %cst_47 = arith.constant dense<0.000000e+00> : vector<2x128xf32>
      %67 = tpu.matmul %65, %66, %cst_47 {dimension_numbers = #tpu.dot_dimension_numbers<[1], [0], [0], [1], [0, 0, 1, 1], [], []>} : vector<2x128xf32>, vector<128x128xf32>, vector<2x128xf32> -> vector<2x128xf32>
      %c0_48 = arith.constant 0 : index
      %c0_49 = arith.constant 0 : index
      %68 = vector.load %arg13[%c0_48, %c0_49] : memref<128x128xf32, #tpu.memory_space<vmem>>, vector<128x128xf32>
      %cst_50 = arith.constant dense<0.000000e+00> : vector<2x128xf32>
      %69 = tpu.matmul %55, %68, %cst_50 {dimension_numbers = #tpu.dot_dimension_numbers<[1], [0], [0], [1], [0, 0, 1, 1], [], []>} : vector<2x128xf32>, vector<128x128xf32>, vector<2x128xf32> -> vector<2x128xf32>
      %70 = arith.addf %67, %69 : vector<2x128xf32>
      %c0_51 = arith.constant 0 : index
      %c0_52 = arith.constant 0 : index
      %71 = vector.load %arg14[%c0_51, %c0_52] : memref<1x128xf32, #tpu.memory_space<vmem>>, vector<1x128xf32>
      %72 = vector.broadcast %71 : vector<1x128xf32> to vector<2x128xf32>
      %73 = arith.addf %70, %72 : vector<2x128xf32>
      %c0_53 = arith.constant 0 : index
      %c0_54 = arith.constant 0 : index
      %74 = vector.load %arg15[%c0_53, %c0_54] : memref<2x128xf32, #tpu.memory_space<vmem>>, vector<2x128xf32>
      tpu.vector_store %arg15[%c0_53, %c0_54], %73 {strides = array<i32>} : memref<2x128xf32, #tpu.memory_space<vmem>>, vector<2x128xf32>,
      %c0_55 = arith.constant 0 : index
      %c0_56 = arith.constant 0 : index
      %75 = vector.load %arg16[%c0_55, %c0_56] : memref<2x128xf32, #tpu.memory_space<vmem>>, vector<2x128xf32>
      tpu.vector_store %arg16[%c0_55, %c0_56], %55 {strides = array<i32>} : memref<2x128xf32, #tpu.memory_space<vmem>>, vector<2x128xf32>,
      %c0_57 = arith.constant 0 : index
      %c0_58 = arith.constant 0 : index
      %76 = vector.load %arg25[%c0_57, %c0_58] : memref<2x1xf32, #tpu.memory_space<vmem>>, vector<2x1xf32>
      %cst_59 = arith.constant 1.000000e+00 : f32
      %77 = vector.broadcast %cst_59 : f32 to vector<2x1xf32>
      %78 = arith.divf %77, %76 : vector<2x1xf32>
      %79 = vector.shape_cast %78 : vector<2x1xf32> to vector<2x1xf32>
      %80 = vector.broadcast %79 : vector<2x1xf32> to vector<2x128xf32>
      %c0_60 = arith.constant 0 : index
      %c0_61 = arith.constant 0 : index
      %81 = vector.load %arg19[%c0_60, %c0_61] : memref<2x128xf32, #tpu.memory_space<vmem>>, vector<2x128xf32>
      tpu.vector_store %arg19[%c0_60, %c0_61], %80 {strides = array<i32>} : memref<2x128xf32, #tpu.memory_space<vmem>>, vector<2x128xf32>,
      %c0_62 = arith.constant 0 : index
      %c0_63 = arith.constant 0 : index
      %82 = vector.load %arg27[%c0_62, %c0_63] : memref<2x1xi32, #tpu.memory_space<vmem>>, vector<2x1xi32>
      %83 = vector.shape_cast %82 : vector<2x1xi32> to vector<2x1xi32>
      %84 = vector.broadcast %83 : vector<2x1xi32> to vector<2x128xi32>
      %c0_64 = arith.constant 0 : index
      %c0_65 = arith.constant 0 : index
      %85 = vector.load %arg20[%c0_64, %c0_65] : memref<2x128xi32, #tpu.memory_space<vmem>>, vector<2x128xi32>
      tpu.vector_store %arg20[%c0_64, %c0_65], %84 {strides = array<i32>} : memref<2x128xi32, #tpu.memory_space<vmem>>, vector<2x128xi32>,
      %86 = tpu.iota {dimensions = array<i32: 1>} : vector<2x8xi32>
      %c0_66 = arith.constant 0 : index
      %c0_67 = arith.constant 0 : index
      %87 = vector.load %arg27[%c0_66, %c0_67] : memref<2x1xi32, #tpu.memory_space<vmem>>, vector<2x1xi32>
      %88 = vector.broadcast %87 : vector<2x1xi32> to vector<2x8xi32>
      %89 = arith.cmpi eq, %86, %88 : vector<2x8xi32>
      %c0_68 = arith.constant 0 : index
      %c0_69 = arith.constant 0 : index
      %90 = vector.load %arg5[%c0_68, %c0_69] : memref<2x8xf32, #tpu.memory_space<vmem>>, vector<2x8xf32>
      %cst_70 = arith.constant -1.000000e+10 : f32
      %91 = vector.broadcast %cst_70 : f32 to vector<2x8xf32>
      %92 = arith.select %89, %91, %90 : vector<2x8xi1>, vector<2x8xf32>
      %c0_71 = arith.constant 0 : index
      %c0_72 = arith.constant 0 : index
      %93 = vector.load %arg18[%c0_71, %c0_72] : memref<2x8xf32, #tpu.memory_space<vmem>>, vector<2x8xf32>
      tpu.vector_store %arg18[%c0_71, %c0_72], %92 {strides = array<i32>} : memref<2x8xf32, #tpu.memory_space<vmem>>, vector<2x8xf32>,
    } else {
    }
    return
  }
  func.func @transform_0(%arg0: i32, %arg1: i32) -> (i32, i32) {
    %c0_i32 = arith.constant 0 : i32
    %c0_i32_0 = arith.constant 0 : i32
    return %arg0, %c0_i32 : i32, i32
  }
  func.func @transform_1(%arg0: i32, %arg1: i32) -> (i32, i32, i32) {
    %c0_i32 = arith.constant 0 : i32
    %c0_i32_0 = arith.constant 0 : i32
    return %arg0, %arg1, %c0_i32 : i32, i32, i32
  }
  func.func @transform_2(%arg0: i32, %arg1: i32) -> (i32, i32) {
    %c0_i32 = arith.constant 0 : i32
    return %arg0, %arg1 : i32, i32
  }
  func.func @transform_3(%arg0: i32, %arg1: i32) -> (i32, i32) {
    %c0_i32 = arith.constant 0 : i32
    %c0_i32_0 = arith.constant 0 : i32
    return %arg0, %c0_i32 : i32, i32
  }
  func.func @transform_4(%arg0: i32, %arg1: i32) -> (i32, i32) {
    %c0_i32 = arith.constant 0 : i32
    %c0_i32_0 = arith.constant 0 : i32
    %c0_i32_1 = arith.constant 0 : i32
    return %c0_i32, %c0_i32_0 : i32, i32
  }
  func.func @transform_5(%arg0: i32, %arg1: i32) -> (i32, i32) {
    %c0_i32 = arith.constant 0 : i32
    %c0_i32_0 = arith.constant 0 : i32
    %c0_i32_1 = arith.constant 0 : i32
    return %c0_i32, %c0_i32_0 : i32, i32
  }
  func.func @transform_6(%arg0: i32, %arg1: i32) -> (i32, i32) {
    %c0_i32 = arith.constant 0 : i32
    %c0_i32_0 = arith.constant 0 : i32
    %c0_i32_1 = arith.constant 0 : i32
    return %c0_i32, %c0_i32_0 : i32, i32
  }
  func.func @transform_7(%arg0: i32, %arg1: i32) -> (i32, i32) {
    %c0_i32 = arith.constant 0 : i32
    %c0_i32_0 = arith.constant 0 : i32
    %c0_i32_1 = arith.constant 0 : i32
    return %c0_i32, %c0_i32_0 : i32, i32
  }
  func.func @transform_8(%arg0: i32, %arg1: i32) -> (i32, i32) {
    %c0_i32 = arith.constant 0 : i32
    %c0_i32_0 = arith.constant 0 : i32
    %c0_i32_1 = arith.constant 0 : i32
    return %c0_i32, %c0_i32_0 : i32, i32
  }
  func.func @transform_9(%arg0: i32, %arg1: i32) -> (i32, i32) {
    %c0_i32 = arith.constant 0 : i32
    %c0_i32_0 = arith.constant 0 : i32
    %c0_i32_1 = arith.constant 0 : i32
    return %c0_i32, %c0_i32_0 : i32, i32
  }
  func.func @transform_10(%arg0: i32, %arg1: i32) -> (i32, i32) {
    %c0_i32 = arith.constant 0 : i32
    %c0_i32_0 = arith.constant 0 : i32
    %c0_i32_1 = arith.constant 0 : i32
    return %c0_i32, %c0_i32_0 : i32, i32
  }
  func.func @transform_11(%arg0: i32, %arg1: i32) -> (i32, i32) {
    %c0_i32 = arith.constant 0 : i32
    %c0_i32_0 = arith.constant 0 : i32
    %c0_i32_1 = arith.constant 0 : i32
    return %c0_i32, %c0_i32_0 : i32, i32
  }
  func.func @transform_12(%arg0: i32, %arg1: i32) -> (i32, i32) {
    %c0_i32 = arith.constant 0 : i32
    %c0_i32_0 = arith.constant 0 : i32
    %c0_i32_1 = arith.constant 0 : i32
    return %c0_i32, %c0_i32_0 : i32, i32
  }
  func.func @transform_13(%arg0: i32, %arg1: i32) -> (i32, i32) {
    %c0_i32 = arith.constant 0 : i32
    %c0_i32_0 = arith.constant 0 : i32
    return %arg0, %c0_i32 : i32, i32
  }
  func.func @transform_14(%arg0: i32, %arg1: i32) -> (i32, i32) {
    %c0_i32 = arith.constant 0 : i32
    %c0_i32_0 = arith.constant 0 : i32
    return %arg0, %c0_i32 : i32, i32
  }
  func.func @transform_15(%arg0: i32, %arg1: i32) -> (i32, i32) {
    %c0_i32 = arith.constant 0 : i32
    return %arg0, %arg1 : i32, i32
  }
  func.func @transform_16(%arg0: i32, %arg1: i32) -> (i32, i32) {
    %c0_i32 = arith.constant 0 : i32
    %c0_i32_0 = arith.constant 0 : i32
    return %arg0, %c0_i32 : i32, i32
  }
  func.func @transform_17(%arg0: i32, %arg1: i32) -> (i32, i32) {
    %c0_i32 = arith.constant 0 : i32
    %c0_i32_0 = arith.constant 0 : i32
    return %arg0, %c0_i32 : i32, i32
  }
  func.func @transform_18(%arg0: i32, %arg1: i32) -> (i32, i32) {
    %c0_i32 = arith.constant 0 : i32
    %c0_i32_0 = arith.constant 0 : i32
    return %arg0, %c0_i32 : i32, i32
  }
}

</mosaic_0001>

<bundles_post_ra>
// kernel: _first_step.1
= control target key start
LH: loop header
LB: loop body
LE: loop exit
PB: predicated region body
PF: predicated region fallthrough
CT: control target
= control target key end

     0   :  { %s2176_s0 = inlined_call_operand.vmem [shape: f32[2,256], index: 0, kind: input, shape index: {}]   ;;  %s2177_s1 = inlined_call_operand.vmem [shape: f32[2,8,128], index: 1, kind: input, shape index: {}]   ;;  %s2178_s2 = inlined_call_operand.vmem [shape: f32[2,8], index: 2, kind: input, shape index: {}, may-alias: {2,3}]   ;;  %s2179_s3 = inlined_call_operand.vmem [shape: f32[2,8], index: 3, kind: input, shape index: {}, may-alias: {2,3}]   ;;  %s2180_s4 = inlined_call_operand.hbm [shape: f32[256,512], index: 4, kind: input, shape index: {}]   ;;  %s2181_s5 = inlined_call_operand.vmem [shape: f32[1,512], index: 5, kind: input, shape index: {}]   ;;  %s2182_s6 = inlined_call_operand.hbm [shape: f32[128,128], index: 6, kind: input, shape index: {}]   ;;  %s2183_s7 = inlined_call_operand.vmem [shape: f32[1,128], index: 7, kind: input, shape index: {}]   ;;  %s2184_s8 = inlined_call_operand.hbm [shape: f32[128,128], index: 8, kind: input, shape index: {}]   ;;  %s2185_s9 = inlined_call_operand.vmem [shape: f32[1,128], index: 9, kind: input, shape index: {}]   ;;  %s2186_s10 = inlined_call_operand.hbm [shape: f32[128,128], index: 10, kind: input, shape index: {}]   ;;  %s2187_s11 = inlined_call_operand.hbm [shape: f32[128,128], index: 11, kind: input, shape index: {}]   ;;  %s2188_s12 = inlined_call_operand.vmem [shape: f32[1,128], index: 12, kind: input, shape index: {}]   ;;  %s2189_s13 = inlined_call_operand.hbm [shape: f32[2,128], index: 13, kind: output, shape index: {0}]   ;;  %s2190_s14 = inlined_call_operand.hbm [shape: f32[2,128], index: 14, kind: output, shape index: {1}]   ;;  %s2191_s15 = inlined_call_operand.hbm [shape: f32[2,8], index: 15, kind: output, shape index: {2}]   ;;  %s2192_s16 = inlined_call_operand.hbm [shape: f32[2,8], index: 16, kind: output, shape index: {3}]   ;;  %s2193_s17 = inlined_call_operand.vmem [shape: f32[2,128], index: 17, kind: output, shape index: {4}]   ;;  %s2194_s18 = inlined_call_operand.vmem [shape: s32[2,128], index: 18, kind: output, shape index: {5}]  }
   0x1   :  { %2196 = sst [smem:[#allocation30_spill]] %s2176_s0 }
   0x2   :  { %2197 = sst [smem:[#allocation31_spill]] %s2177_s1 }
   0x3   :  { %2198 = sst [smem:[#allocation32_spill]] %s2178_s2 }
   0x4   :  { %24 = vsyncpa [#allocation10], 0 }
   0x5   :  { %25 = vsyncpa [#allocation13], 0 }
   0x6   :  { %26 = vsyncpa [#allocation16], 0 }
   0x7   :  { %27 = vsyncpa [#allocation11], 0 }
   0x8   :  { %28 = vsyncpa [#allocation20], 0 }
   0x9   :  { %29 = vsyncpa [#allocation23], 0  ;;  %s1828_s27 = smov [#allocation12]  }
   0xa   :  { %s57_s28 = sshll.u32 %s1828_s27, 4  ;;  %s58_s28 = int_to_ptr.vmem [resolvable:$true] %s57_s28 }
   0xb   :  { %s1644_s29 = scalar_lea.vmem %s58_s28, 2048  ;;  %p1649_p1 = scmp.lt.s32.totalorder %s58_s28, %s58_s28 }
   0xc   :  { %p1645_p0 = scmp.ne.s32.totalorder %s58_s28, %s1644_s29  ;;  %p1650_p2 = scmp.lt.s32.totalorder %s1644_s29, %s1644_s29 }
   0xe   :  { %p1651_p3 = por %p1650_p2, %p1649_p1 }
  0x10   :  { %p1652_p4 = pnand %p1651_p3, %p1645_p0 }
  0x12   :  { %1655 = shalt.err (!%p1652_p4)
}
  0x13   :  { %s1829_s30 = smov 128   ;;  %s1830_s0 = smov 8  }
  0x14   :  { %63 = dma.hbm_to_vmem [thread:$0]  %s2182_s6, 2048, %s58_s28, [#allocation13], %s1829_s30, %s1829_s30, %s1830_s0  }
  0x15   :  { %s1831_s20 = smov [#allocation15]   ;;  %s1832_s22 = smov [#allocation9]  }
  0x16   :  { %s85_s21 = sshll.u32 %s1831_s20, 4  ;;  %s43_s2 = sshll.u32 %s1832_s22, 4  ;;  %s86_s21 = int_to_ptr.vmem [resolvable:$true] %s85_s21  ;;  %s44_s2 = int_to_ptr.vmem [resolvable:$true] %s43_s2 }
  0x17   :  { %s1664_s23 = scalar_lea.vmem %s86_s21, 2048  ;;  %p1669_p6 = scmp.lt.s32.totalorder %s86_s21, %s86_s21 }
  0x18   :  { %p1665_p5 = scmp.ne.s32.totalorder %s86_s21, %s1664_s23  ;;  %p1670_p7 = scmp.lt.s32.totalorder %s1664_s23, %s1664_s23 }
  0x1a   :  { %p1671_p8 = por %p1670_p7, %p1669_p6 }
  0x1c   :  { %p1672_p9 = pnand %p1671_p8, %p1665_p5 }
  0x1e   :  { %1675 = shalt.err (!%p1672_p9)
}
  0x1f   :  { %91 = dma.hbm_to_vmem [thread:$0]  %s2186_s10, 2048, %s86_s21, [#allocation16], %s1829_s30, %s1829_s30, %s1830_s0  }
  0x20   :  { %s1684_s6 = scalar_lea.vmem %s44_s2, 16384  ;;  %p1689_p11 = scmp.lt.s32.totalorder %s44_s2, %s44_s2 }
  0x21   :  { %p1685_p10 = scmp.ne.s32.totalorder %s44_s2, %s1684_s6  ;;  %p1690_p12 = scmp.lt.s32.totalorder %s1684_s6, %s1684_s6 }
  0x23   :  { %p1691_p13 = por %p1690_p12, %p1689_p11 }
  0x25   :  { %p1692_p0 = pnand %p1691_p13, %p1685_p10 }
  0x27   :  { %1695 = shalt.err (!%p1692_p0)
}
  0x28   :  { %s1833_s26 = smov 512   ;;  %s1834_s27 = smov 32  }
  0x29   :  { %49 = dma.hbm_to_vmem [thread:$0]  %s2180_s4, 16384, %s44_s2, [#allocation10], %s1833_s26, %s1833_s26, %s1834_s27  }
  0x2a   :  { %s1835_s19 = smov [#allocation14]   ;;  %s1836_s20 = smov [#allocation17]  }
  0x2b   :  { %s71_s1 = sshll.u32 %s1835_s19, 4  ;;  %s97_s22 = sshll.u32 %s1836_s20, 4  ;;  %s72_s1 = int_to_ptr.vmem [resolvable:$true] %s71_s1  ;;  %s98_s22 = int_to_ptr.vmem [resolvable:$true] %s97_s22 }
  0x2c   :  { %s1704_s10 = scalar_lea.vmem %s72_s1, 2048  ;;  %p1709_p2 = scmp.lt.s32.totalorder %s72_s1, %s72_s1 }
  0x2d   :  { %p1705_p1 = scmp.ne.s32.totalorder %s72_s1, %s1704_s10  ;;  %p1710_p3 = scmp.lt.s32.totalorder %s1704_s10, %s1704_s10 }
  0x2f   :  { %p1711_p4 = por %p1710_p3, %p1709_p2 }
  0x31   :  { %p1712_p5 = pnand %p1711_p4, %p1705_p1 }
  0x33   :  { %1715 = shalt.err (!%p1712_p5)
}
  0x34   :  { %77 = dma.hbm_to_vmem [thread:$0]  %s2184_s8, 2048, %s72_s1, [#allocation13], %s1829_s30, %s1829_s30, %s1830_s0  }
  0x35   :  { %s1724_s4 = scalar_lea.vmem %s98_s22, 2048  ;;  %p1729_p7 = scmp.lt.s32.totalorder %s98_s22, %s98_s22 }
  0x36   :  { %p1725_p6 = scmp.ne.s32.totalorder %s98_s22, %s1724_s4  ;;  %p1730_p8 = scmp.lt.s32.totalorder %s1724_s4, %s1724_s4 }
  0x38   :  { %p1731_p9 = por %p1730_p8, %p1729_p7 }
  0x3a   :  { %p1732_p10 = pnand %p1731_p9, %p1725_p6 }
  0x3c   :  { %1735 = shalt.err (!%p1732_p10)
}
  0x3d   :  { %103 = dma.hbm_to_vmem [thread:$0]  %s2187_s11, 2048, %s98_s22, [#allocation16], %s1829_s30, %s1829_s30, %s1830_s0  }
  0x3e   :  { %1816 = dma.done.wait [#allocation10], 16384  }
  0x3f   :  { %1817 = vsyncadd [#allocation10], 4294950912 }
  0x40   :  { %1818 = dma.done.wait [#allocation13], 4096  }
  0x41   :  { %1819 = vsyncadd [#allocation13], 4294963200 }
  0x42   :  { %1820 = dma.done.wait [#allocation16], 4096  }
  0x43   :  { %1821 = vsyncadd [#allocation16], 4294963200  ;;  %v187_v0 = vld [vmem:[#allocation9 + $0x1e8] sm:$0xff]  ;;  %v186_v1 = vld [vmem:[#allocation9 + $0x1e0] sm:$0xff]  ;;  %s2199_s30 = sld [smem:[#allocation30_spill]]  ;;  %vm1838_vm0 = vmmov 0  }
  0x44   :  { %v183_v2 = vld [vmem:[#allocation9 + $0x1c8] sm:$0xff]  ;;  %287 = vmatprep.subr.mxu0 %v187_v0  ;;  %v182_v3 = vld [vmem:[#allocation9 + $0x1c0] sm:$0xff]  ;;  %v189_v12 = vld [vmem:[#allocation9 + $0x1f8] sm:$0xff]  ;;  %vm548_vm1 = vcmask 1024   ;;  %vm544_vm2 = vcmask 1041408   ;;  %s2200_s27 = sld [smem:[#allocation31_spill]] }
  0x45   :  { %288 = vmatpush1.msra.mxu0 %v186_v1  ;;  %v179_v4 = vld [vmem:[#allocation9 + $0x1a8] sm:$0xff]  ;;  %v178_v5 = vld [vmem:[#allocation9 + $0x1a0] sm:$0xff]  ;;  %358 = vmatprep.subr.mxu1 %v189_v12  ;;  %v188_v14 = vld [vmem:[#allocation9 + $0x1f0] sm:$0xff]  ;;  %s2201_s20 = sld [smem:[#allocation32_spill]]  ;;  %vm742_vm3 = vcmask 1041409   ;;  %vm745_vm4 = vcmask 58368  }
  0x46   :  { %289 = vmatprep.subr.mxu0 %v183_v2  ;;  %v175_v6 = vld [vmem:[#allocation9 + $0x188] sm:$0xff]  ;;  %v174_v7 = vld [vmem:[#allocation9 + $0x180] sm:$0xff]  ;;  %359 = vmatpush1.msra.mxu1 %v188_v14  ;;  %v185_v16 = vld [vmem:[#allocation9 + $0x1d8] sm:$0xff]  ;;  %vm781_vm5 = vcmask 64512   ;;  %s1842_s21 = smov [#allocation19]  }
  0x47   :  { %290 = vmatpush1.msra.mxu0 %v182_v3  ;;  %v171_v8 = vld [vmem:[#allocation9 + $0x168] sm:$0xff]  ;;  %v170_v9 = vld [vmem:[#allocation9 + $0x160] sm:$0xff]  ;;  %v184_v17 = vld [vmem:[#allocation9 + $0x1d0] sm:$0xff]  ;;  %360 = vmatprep.subr.mxu1 %v185_v16  ;;  %s1301_s23 = sshll.u32 %s1842_s21, 4  ;;  %s1302_s23 = int_to_ptr.vmem [resolvable:$true] %s1301_s23 }
  0x48   :  { %291 = vmatprep.subr.mxu0 %v179_v4  ;;  %v167_v10 = vld [vmem:[#allocation9 + $0x148] sm:$0xff]  ;;  %v166_v11 = vld [vmem:[#allocation9 + $0x140] sm:$0xff]  ;;  %v181_v19 = vld [vmem:[#allocation9 + $0x1b8] sm:$0xff]  ;;  %361 = vmatpush1.msra.mxu1 %v184_v17  ;;  %s1736_s4 = scalar_lea.vmem %s1302_s23, 32  ;;  %p1741_p12 = scmp.lt.s32.totalorder %s1302_s23, %s1302_s23 }
  0x49   :  { %292 = vmatpush1.msra.mxu0 %v178_v5  ;;  %v163_v13 = vld [vmem:[#allocation9 + $0x128] sm:$0xff]  ;;  %v162_v15 = vld [vmem:[#allocation9 + $0x120] sm:$0xff]  ;;  %v180_v21 = vld [vmem:[#allocation9 + $0x1b0] sm:$0xff]  ;;  %362 = vmatprep.subr.mxu1 %v181_v19  ;;  %p1737_p11 = scmp.ne.s32.totalorder %s1302_s23, %s1736_s4  ;;  %p1742_p13 = scmp.lt.s32.totalorder %s1736_s4, %s1736_s4 }
  0x4a   :  { %293 = vmatprep.subr.mxu0 %v175_v6  ;;  %v159_v18 = vld [vmem:[#allocation9 + $0x108] sm:$0xff]  ;;  %v158_v20 = vld [vmem:[#allocation9 + $0x100] sm:$0xff]  ;;  %v177_v22 = vld [vmem:[#allocation9 + $0x198] sm:$0xff]  ;;  %363 = vmatpush1.msra.mxu1 %v180_v21 }
  0x4b   :  { %294 = vmatpush1.msra.mxu0 %v174_v7  ;;  %v155_v23 = vld [vmem:[#allocation9 + $0xe8] sm:$0xff]  ;;  %v176_v24 = vld [vmem:[#allocation9 + $0x190] sm:$0xff]  ;;  %v154_v25 = vld [vmem:[#allocation9 + $0xe0] sm:$0xff]  ;;  %364 = vmatprep.subr.mxu1 %v177_v22  ;;  %p1743_p0 = por %p1742_p13, %p1741_p12 }
  0x4c   :  { %295 = vmatprep.subr.mxu0 %v171_v8  ;;  %v173_v26 = vld [vmem:[#allocation9 + $0x178] sm:$0xff]  ;;  %v151_v27 = vld [vmem:[#allocation9 + $0xc8] sm:$0xff]  ;;  %v172_v28 = vld [vmem:[#allocation9 + $0x170] sm:$0xff]  ;;  %365 = vmatpush1.msra.mxu1 %v176_v24 }
  0x4d   :  { %296 = vmatpush1.msra.mxu0 %v170_v9  ;;  %v150_v29 = vld [vmem:[#allocation9 + $0xc0] sm:$0xff]  ;;  %v169_v30 = vld [vmem:[#allocation9 + $0x158] sm:$0xff]  ;;  %v147_v31 = vld [vmem:[#allocation9 + $0xa8] sm:$0xff]  ;;  %366 = vmatprep.subr.mxu1 %v173_v26  ;;  %p1744_p1 = pnand %p1743_p0, %p1737_p11 }
  0x4e   :  { %297 = vmatprep.subr.mxu0 %v167_v10  ;;  %v168_v32 = vld [vmem:[#allocation9 + $0x150] sm:$0xff]  ;;  %v146_v33 = vld [vmem:[#allocation9 + $0xa0] sm:$0xff]  ;;  %367 = vmatpush1.msra.mxu1 %v172_v28  ;;  %v165_v34 = vld [vmem:[#allocation9 + $0x138] sm:$0xff] }
  0x4f   :  { %298 = vmatpush1.msra.mxu0 %v166_v11  ;;  %v143_v35 = vld [vmem:[#allocation9 + $0x88] sm:$0xff]  ;;  %368 = vmatprep.subr.mxu1 %v169_v30  ;;  %v164_v36 = vld [vmem:[#allocation9 + $0x130] sm:$0xff]  ;;  %v142_v37 = vld [vmem:[#allocation9 + $0x80] sm:$0xff] }
  0x50   :  { %299 = vmatprep.subr.mxu0 %v163_v13  ;;  %369 = vmatpush1.msra.mxu1 %v168_v32  ;;  %v161_v38 = vld [vmem:[#allocation9 + $0x118] sm:$0xff]  ;;  %v139_v39 = vld [vmem:[#allocation9 + $0x68] sm:$0xff]  ;;  %v160_v40 = vld [vmem:[#allocation9 + $0x110] sm:$0xff] }
  0x51   :  { %300 = vmatpush1.msra.mxu0 %v162_v15  ;;  %370 = vmatprep.subr.mxu1 %v165_v34  ;;  %v138_v41 = vld [vmem:[#allocation9 + $0x60] sm:$0xff]  ;;  %v157_v42 = vld [vmem:[#allocation9 + $0xf8] sm:$0xff]  ;;  %v135_v43 = vld [vmem:[#allocation9 + $0x48] sm:$0xff] }
  0x52   :  { %301 = vmatprep.subr.mxu0 %v159_v18  ;;  %371 = vmatpush1.msra.mxu1 %v164_v36  ;;  %v156_v44 = vld [vmem:[#allocation9 + $0xf0] sm:$0xff]  ;;  %v134_v45 = vld [vmem:[#allocation9 + $0x40] sm:$0xff]  ;;  %v153_v46 = vld [vmem:[#allocation9 + $0xd8] sm:$0xff] }
  0x53   :  { %302 = vmatpush1.msra.mxu0 %v158_v20  ;;  %372 = vmatprep.subr.mxu1 %v161_v38  ;;  %v131_v47 = vld [vmem:[#allocation9 + $0x28] sm:$0xff]  ;;  %v152_v48 = vld [vmem:[#allocation9 + $0xd0] sm:$0xff]  ;;  %v130_v49 = vld [vmem:[#allocation9 + $0x20] sm:$0xff] }
  0x54   :  { %303 = vmatprep.subr.mxu0 %v155_v23  ;;  %373 = vmatpush1.msra.mxu1 %v160_v40  ;;  %v149_v50 = vld [vmem:[#allocation9 + $0xb8] sm:$0xff]  ;;  %v127_v51 = vld [vmem:[#allocation9 + $0x8] sm:$0xff]  ;;  %v148_v52 = vld [vmem:[#allocation9 + $0xb0] sm:$0xff] }
  0x55   :  { %304 = vmatpush1.msra.mxu0 %v154_v25  ;;  %374 = vmatprep.subr.mxu1 %v157_v42  ;;  %v126_v53 = vld [vmem:[#allocation9] sm:$0xff]  ;;  %v145_v54 = vld [vmem:[#allocation9 + $0x98] sm:$0xff]  ;;  %v251_v55 = vld [vmem:[#allocation9 + $0x3e8] sm:$0xff] }
  0x56   :  { %305 = vmatprep.subr.mxu0 %v151_v27  ;;  %375 = vmatpush1.msra.mxu1 %v156_v44  ;;  %v144_v56 = vld [vmem:[#allocation9 + $0x90] sm:$0xff]  ;;  %v250_v57 = vld [vmem:[#allocation9 + $0x3e0] sm:$0xff]  ;;  %v141_v58 = vld [vmem:[#allocation9 + $0x78] sm:$0xff] }
  0x57   :  { %306 = vmatpush1.msra.mxu0 %v150_v29  ;;  %376 = vmatprep.subr.mxu1 %v153_v46  ;;  %v247_v59 = vld [vmem:[#allocation9 + $0x3c8] sm:$0xff]  ;;  %v140_v60 = vld [vmem:[#allocation9 + $0x70] sm:$0xff]  ;;  %v246_v61 = vld [vmem:[#allocation9 + $0x3c0] sm:$0xff] }
  0x58   :  { %307 = vmatprep.subr.mxu0 %v147_v31  ;;  %377 = vmatpush1.msra.mxu1 %v152_v48  ;;  %v137_v62 = vld [vmem:[#allocation9 + $0x58] sm:$0xff]  ;;  %v243_v63 = vld [vmem:[#allocation9 + $0x3a8] sm:$0xff]  ;;  %v136_v0 = vld [vmem:[#allocation9 + $0x50] sm:$0xff] }
  0x59   :  { %308 = vmatpush1.msra.mxu0 %v146_v33  ;;  %378 = vmatprep.subr.mxu1 %v149_v50  ;;  %v242_v1 = vld [vmem:[#allocation9 + $0x3a0] sm:$0xff]  ;;  %v133_v2 = vld [vmem:[#allocation9 + $0x38] sm:$0xff]  ;;  %v239_v3 = vld [vmem:[#allocation9 + $0x388] sm:$0xff] }
  0x5a   :  { %309 = vmatprep.subr.mxu0 %v143_v35  ;;  %379 = vmatpush1.msra.mxu1 %v148_v52  ;;  %v132_v4 = vld [vmem:[#allocation9 + $0x30] sm:$0xff]  ;;  %v238_v5 = vld [vmem:[#allocation9 + $0x380] sm:$0xff]  ;;  %v129_v6 = vld [vmem:[#allocation9 + $0x18] sm:$0xff] }
  0x5b   :  { %310 = vmatpush1.msra.mxu0 %v142_v37  ;;  %380 = vmatprep.subr.mxu1 %v145_v54  ;;  %v235_v7 = vld [vmem:[#allocation9 + $0x368] sm:$0xff]  ;;  %v128_v8 = vld [vmem:[#allocation9 + $0x10] sm:$0xff]  ;;  %v234_v10 = vld [vmem:[#allocation9 + $0x360] sm:$0xff] }
  0x5c   :  { %311 = vmatprep.subr.mxu0 %v139_v39  ;;  %381 = vmatpush1.msra.mxu1 %v144_v56  ;;  %v1971_v9 = vld.sshfl [vmem:[%s2199_s30] sm:$0x33 pattern:$0x76325410]  ;;  %v253_v11 = vld [vmem:[#allocation9 + $0x3f8] sm:$0xff]  ;;  %v231_v12 = vld [vmem:[#allocation9 + $0x348] sm:$0xff] }
  0x5d   :  { %312 = vmatpush1.msra.mxu0 %v138_v41  ;;  %382 = vmatprep.subr.mxu1 %v141_v58  ;;  %v252_v13 = vld [vmem:[#allocation9 + $0x3f0] sm:$0xff]  ;;  %v230_v14 = vld [vmem:[#allocation9 + $0x340] sm:$0xff]  ;;  %v249_v15 = vld [vmem:[#allocation9 + $0x3d8] sm:$0xff]  ;;  %v1975_v16 = vcombine.high %v1971_v9, %v1971_v9 }
  0x5e   :  { %313 = vmatprep.subr.mxu0 %v135_v43  ;;  %383 = vmatpush1.msra.mxu1 %v140_v60  ;;  %v227_v17 = vld [vmem:[#allocation9 + $0x328] sm:$0xff]  ;;  %v226_v18 = vld [vmem:[#allocation9 + $0x320] sm:$0xff]  ;;  %v248_v19 = vld [vmem:[#allocation9 + $0x3d0] sm:$0xff] }
  0x5f   :  { %314 = vmatpush1.msra.mxu0 %v134_v45  ;;  %384 = vmatprep.subr.mxu1 %v137_v62  ;;  %v223_v20 = vld [vmem:[#allocation9 + $0x308] sm:$0xff]  ;;  %v245_v21 = vld [vmem:[#allocation9 + $0x3b8] sm:$0xff]  ;;  %v222_v22 = vld [vmem:[#allocation9 + $0x300] sm:$0xff] }
  0x60   :  { %315 = vmatprep.subr.mxu0 %v131_v47  ;;  %385 = vmatpush1.msra.mxu1 %v136_v0  ;;  %v244_v23 = vld [vmem:[#allocation9 + $0x3b0] sm:$0xff]  ;;  %v219_v24 = vld [vmem:[#allocation9 + $0x2e8] sm:$0xff]  ;;  %v241_v25 = vld [vmem:[#allocation9 + $0x398] sm:$0xff] }
  0x61   :  { %316 = vmatpush1.msra.mxu0 %v130_v49  ;;  %386 = vmatprep.subr.mxu1 %v133_v2  ;;  %v218_v26 = vld [vmem:[#allocation9 + $0x2e0] sm:$0xff]  ;;  %v240_v27 = vld [vmem:[#allocation9 + $0x390] sm:$0xff]  ;;  %v215_v28 = vld [vmem:[#allocation9 + $0x2c8] sm:$0xff] }
  0x62   :  { %317 = vmatprep.subr.mxu0 %v127_v51  ;;  %387 = vmatpush1.msra.mxu1 %v132_v4  ;;  %v237_v29 = vld [vmem:[#allocation9 + $0x378] sm:$0xff]  ;;  %v214_v30 = vld [vmem:[#allocation9 + $0x2c0] sm:$0xff]  ;;  %v236_v31 = vld [vmem:[#allocation9 + $0x370] sm:$0xff] }
  0x63   :  { %318 = vmatpush1.msra.mxu0 %v126_v53  ;;  %388 = vmatprep.subr.mxu1 %v129_v6  ;;  %v211_v32 = vld [vmem:[#allocation9 + $0x2a8] sm:$0xff]  ;;  %v233_v33 = vld [vmem:[#allocation9 + $0x358] sm:$0xff]  ;;  %v210_v34 = vld [vmem:[#allocation9 + $0x2a0] sm:$0xff] }
  0x64   :  { %319 = vmatprep.subr.mxu0 %v251_v55  ;;  %389 = vmatpush1.msra.mxu1 %v128_v8  ;;  %v232_v35 = vld [vmem:[#allocation9 + $0x350] sm:$0xff]  ;;  %v207_v36 = vld [vmem:[#allocation9 + $0x288] sm:$0xff]  ;;  %v229_v37 = vld [vmem:[#allocation9 + $0x338] sm:$0xff] }
  0x65   :  { %320 = vmatpush2.msra.mxu0 %v250_v57  ;;  %390 = vmatprep.subr.mxu1 %v253_v11  ;;  %v206_v38 = vld [vmem:[#allocation9 + $0x280] sm:$0xff]  ;;  %v228_v39 = vld [vmem:[#allocation9 + $0x330] sm:$0xff]  ;;  %v203_v40 = vld [vmem:[#allocation9 + $0x268] sm:$0xff] }
  0x66   :  { %321 = vmatprep.subr.mxu0 %v247_v59  ;;  %391 = vmatpush2.msra.mxu1 %v252_v13  ;;  %v225_v41 = vld [vmem:[#allocation9 + $0x318] sm:$0xff]  ;;  %v202_v42 = vld [vmem:[#allocation9 + $0x260] sm:$0xff]  ;;  %v224_v43 = vld [vmem:[#allocation9 + $0x310] sm:$0xff] }
  0x67   :  { %322 = vmatpush2.msra.mxu0 %v246_v61  ;;  %392 = vmatprep.subr.mxu1 %v249_v15  ;;  %v199_v44 = vld [vmem:[#allocation9 + $0x248] sm:$0xff]  ;;  %v221_v45 = vld [vmem:[#allocation9 + $0x2f8] sm:$0xff]  ;;  %v198_v46 = vld [vmem:[#allocation9 + $0x240] sm:$0xff] }
  0x68   :  { %323 = vmatprep.subr.mxu0 %v243_v63  ;;  %351 = vmatprep.mubr.f32.mxu0 %v1975_v16  ;;  %v220_v47 = vld [vmem:[#allocation9 + $0x2f0] sm:$0xff]  ;;  %v195_v48 = vld [vmem:[#allocation9 + $0x228] sm:$0xff]  ;;  %v217_v49 = vld [vmem:[#allocation9 + $0x2d8] sm:$0xff] }
  0x69   :  { %324 = vmatpush2.msra.mxu0 %v242_v1  ;;  %393 = vmatpush2.msra.mxu1 %v248_v19  ;;  %v194_v50 = vld [vmem:[#allocation9 + $0x220] sm:$0xff]  ;;  %v216_v51 = vld [vmem:[#allocation9 + $0x2d0] sm:$0xff]  ;;  %v191_v52 = vld [vmem:[#allocation9 + $0x208] sm:$0xff] }
  0x6a   :  { %325 = vmatprep.subr.mxu0 %v239_v3  ;;  %394 = vmatprep.subr.mxu1 %v245_v21  ;;  %v213_v53 = vld [vmem:[#allocation9 + $0x2b8] sm:$0xff]  ;;  %v190_v54 = vld [vmem:[#allocation9 + $0x200] sm:$0xff]  ;;  %v212_v55 = vld [vmem:[#allocation9 + $0x2b0] sm:$0xff]  ;;  %v1837_v3 = vmov 0.0   ;;  %v256_v21 = vlaneseq }
  0x6b   :  { %326 = vmatpush2.msra.mxu0 %v238_v5  ;;  %395 = vmatpush2.msra.mxu1 %v244_v23  ;;  %v209_v56 = vld [vmem:[#allocation9 + $0x298] sm:$0xff]  ;;  %v208_v57 = vld [vmem:[#allocation9 + $0x290] sm:$0xff]  ;;  %552 = vst [vmem:[#allocation7] sm:$0x3] %v1837_v3  ;;  %v462_v5 = vld [vmem:[#allocation12 + $0x68] sm:$0xff] }
  0x6c   :  { %327 = vmatprep.subr.mxu0 %v235_v7  ;;  %396 = vmatprep.subr.mxu1 %v241_v25  ;;  %v205_v58 = vld [vmem:[#allocation9 + $0x278] sm:$0xff]  ;;  %v204_v59 = vld [vmem:[#allocation9 + $0x270] sm:$0xff]  ;;  %v461_v6 = vld [vmem:[#allocation12 + $0x60] sm:$0xff]  ;;  %551 = vst.msk [vmem:[#allocation6] sm:$0x3] %vm548_vm1, %v1837_v3 }
  0x6d   :  { %328 = vmatpush2.msra.mxu0 %v234_v10  ;;  %397 = vmatpush2.msra.mxu1 %v240_v27  ;;  %v201_v60 = vld [vmem:[#allocation9 + $0x258] sm:$0xff]  ;;  %v200_v61 = vld [vmem:[#allocation9 + $0x250] sm:$0xff]  ;;  %v457_v10 = vld [vmem:[#allocation12 + $0x40] sm:$0xff] }
  0x6e   :  { %329 = vmatprep.subr.mxu0 %v231_v12  ;;  %398 = vmatprep.subr.mxu1 %v237_v29  ;;  %v197_v62 = vld [vmem:[#allocation9 + $0x238] sm:$0xff]  ;;  %v196_v63 = vld [vmem:[#allocation9 + $0x230] sm:$0xff]  ;;  %v454_v13 = vld [vmem:[#allocation12 + $0x28] sm:$0xff] }
  0x6f   :  { %330 = vmatpush2.msra.mxu0 %v230_v14  ;;  %399 = vmatpush2.msra.mxu1 %v236_v31  ;;  %v193_v0 = vld [vmem:[#allocation9 + $0x218] sm:$0xff]  ;;  %v192_v1 = vld [vmem:[#allocation9 + $0x210] sm:$0xff]  ;;  %v453_v14 = vld [vmem:[#allocation12 + $0x20] sm:$0xff] }
  0x70   :  { %331 = vmatprep.subr.mxu0 %v227_v17  ;;  %400 = vmatprep.subr.mxu1 %v233_v33  ;;  %v464_v2 = vld [vmem:[#allocation12 + $0x78] sm:$0xff]  ;;  %v463_v4 = vld [vmem:[#allocation12 + $0x70] sm:$0xff]  ;;  %v449_v19 = vld [vmem:[#allocation12] sm:$0xff] }
  0x71   :  { %332 = vmatpush2.msra.mxu0 %v226_v18  ;;  %401 = vmatpush2.msra.mxu1 %v232_v35  ;;  %v460_v7 = vld [vmem:[#allocation12 + $0x58] sm:$0xff]  ;;  %v459_v8 = vld [vmem:[#allocation12 + $0x50] sm:$0xff]  ;;  %v450_v18 = vld [vmem:[#allocation12 + $0x8] sm:$0xff] }
  0x72   :  { %333 = vmatprep.subr.mxu0 %v223_v20  ;;  %402 = vmatprep.subr.mxu1 %v229_v37  ;;  %v456_v11 = vld [vmem:[#allocation12 + $0x38] sm:$0xff]  ;;  %v455_v12 = vld [vmem:[#allocation12 + $0x30] sm:$0xff]  ;;  %v1839_v20 = vmov -1e+30  }
  0x73   :  { %334 = vmatpush2.msra.mxu0 %v222_v22  ;;  %403 = vmatpush2.msra.mxu1 %v228_v39  ;;  %v452_v15 = vld [vmem:[#allocation12 + $0x18] sm:$0xff]  ;;  %v451_v17 = vld [vmem:[#allocation12 + $0x10] sm:$0xff]  ;;  %550 = vst.msk [vmem:[#allocation5] sm:$0x3] %vm548_vm1, %v1839_v20  ;;  %v2008_v22 = vshrl.u32 %v256_v21, 7 }
  0x74   :  { %335 = vmatprep.subr.mxu0 %v219_v24  ;;  %404 = vmatprep.subr.mxu1 %v225_v41  ;;  %v254_v24 = vld [vmem:[%s2181_s5] sm:$0xf] }
  0x75   :  { %336 = vmatpush2.msra.mxu0 %v218_v26  ;;  %405 = vmatpush2.msra.mxu1 %v224_v43  ;;  %v258_v23 = vsub.s32 0, %v2008_v22  ;;  %v262_v26 = vsub.s32 1, %v2008_v22  ;;  %v1103_v20 = vld [vmem:[#allocation17 + $0x30] sm:$0xff] }
  0x76   :  { %337 = vmatprep.subr.mxu0 %v215_v28  ;;  %406 = vmatprep.subr.mxu1 %v221_v45 }
  0x77   :  { %338 = vmatpush2.msra.mxu0 %v214_v30  ;;  %407 = vmatpush2.msra.mxu1 %v220_v47  ;;  %v259_v25 = vrot.slane %v254_v24, %v258_v23  ;;  %v263_v30 = vrot.slane %v254_v24, %v262_v26  ;;  %v1101_v23 = vld [vmem:[#allocation17 + $0x20] sm:$0xff]  ;;  %v1098_v26 = vld [vmem:[#allocation17 + $0x8] sm:$0xff] }
  0x78   :  { %339 = vmatprep.subr.mxu0 %v211_v32  ;;  %408 = vmatprep.subr.mxu1 %v217_v49 }
  0x79   :  { %340 = vmatpush2.msra.mxu0 %v210_v34  ;;  %409 = vmatpush2.msra.mxu1 %v216_v51 }
  0x7a   :  { %341 = vmatprep.subr.mxu0 %v207_v36  ;;  %410 = vmatprep.subr.mxu1 %v213_v53  ;;  %v270_v36 = vsub.s32 3, %v2008_v22 }
  0x7b   :  { %342 = vmatpush2.msra.mxu0 %v206_v38  ;;  %411 = vmatpush2.msra.mxu1 %v212_v55  ;;  %v266_v38 = vsub.s32 2, %v2008_v22 }
  0x7c   :  { %343 = vmatprep.subr.mxu0 %v203_v40  ;;  %412 = vmatprep.subr.mxu1 %v209_v56  ;;  %v271_v40 = vrot.slane %v254_v24, %v270_v36 }
  0x7d   :  { %344 = vmatpush2.msra.mxu0 %v202_v42  ;;  %413 = vmatpush2.msra.mxu1 %v208_v57  ;;  %v267_v43 = vrot.slane %v254_v24, %v266_v38  ;;  %v1100_v24 = vld [vmem:[#allocation17 + $0x18] sm:$0xff] }
  0x7e   :  { %345 = vmatprep.subr.mxu0 %v199_v44  ;;  %422 = vmatprep.mubr.f32.mxu1 %v1975_v16 }
  0x7f   :  { %346 = vmatpush2.msra.mxu0 %v198_v46  ;;  %414 = vmatprep.subr.mxu1 %v205_v58 }
  0x80   :  { %347 = vmatprep.subr.mxu0 %v195_v48  ;;  %415 = vmatpush2.msra.mxu1 %v204_v59  ;;  %v1840_v59 = vmov 0  }
  0x81   :  { %348 = vmatpush2.msra.mxu0 %v194_v50  ;;  %416 = vmatprep.subr.mxu1 %v201_v60  ;;  %553 = vst.msk [vmem:[#allocation8] sm:$0x3] %vm548_vm1, %v1840_v59 }
  0x82   :  { %349 = vmatprep.subr.mxu0 %v191_v52  ;;  %417 = vmatpush2.msra.mxu1 %v200_v61 }
  0x83   :  { %350 = vmatpush2.msra.mxu0 %v190_v54  ;;  %418 = vmatprep.subr.mxu1 %v197_v62  ;;  %v1354_v54 = vld [vmem:[%s2183_s7] ss:$0 sm:$0xff]  ;;  %v1841_v62 = vmov 1966171168  }
  0x84   :  { %352 = vmatmul.mubr.f32.vlgmr.msra.gmra.mxu0 %v1971_v9  ;;  %419 = vmatpush2.msra.mxu1 %v196_v63  ;;  %v567_v63 = vunpack.c.l.s4 %v1841_v62  ;;  %v1002_v62 = vld [vmem:[#allocation14 + $0x70] sm:$0xff] }
  0x85   :  { %420 = vmatprep.subr.mxu1 %v193_v0  ;;  %1436 = vmatprep.subr.mxu0 %v1837_v3 }
  0x86   :  { %421 = vmatpush2.msra.mxu1 %v192_v1  ;;  %1437 = vmatpush3.msra.mxu0 %v464_v2  ;;  %v568_v1 = vunpack.c.0.s8 %v567_v63  ;;  %v1001_v63 = vld [vmem:[#allocation14 + $0x68] sm:$0xff] }
  0x87   :  { %423 = vmatmul.mubr.f32.vlgmr.msra.gmra.mxu1 %v1971_v9  ;;  %1481 = vmatprep.subr.mxu1 %v1837_v3  ;;  %v458_v9 = vld [vmem:[#allocation12 + $0x48] sm:$0xff] }
  0x88   :  { %1438 = vmatprep.subr.mxu0 %v1837_v3  ;;  %1468 = vmatprep.mubr.msk.f32.mxu0 %vm1838_vm0, %v1837_v3 }
  0x89   :  { %1439 = vmatpush3.msra.mxu0 %v463_v4  ;;  %1483 = vmatprep.mubr.msk.f32.mxu1 %vm1838_vm0, %v1837_v3  ;;  %v571_v4 = vsub.s32 %v568_v1, %v2008_v22  ;;  %v1102_v22 = vld [vmem:[#allocation17 + $0x28] sm:$0xff]  ;;  %v999_v1 = vld [vmem:[#allocation14 + $0x58] sm:$0xff] }
  0x8a   :  { %1440 = vmatprep.subr.mxu0 %v1837_v3  ;;  %1614 = vset.pattern.permute.xlu0 %v1840_v59 }
  0x8b   :  { %1441 = vmatpush3.msra.mxu0 %v462_v5  ;;  %1615 = vset.pattern.permute.xlu1 %v1840_v59 }
  0x8c   :  { %1442 = vmatprep.subr.mxu0 %v1837_v3 }
  0x8d   :  { %1443 = vmatpush3.msra.mxu0 %v461_v6 }
  0x8e   :  { %1444 = vmatprep.subr.mxu0 %v1837_v3 }
  0x8f   :  { %1445 = vmatpush3.msra.mxu0 %v460_v7  ;;  %v2037_v7 = vld [vmem:[%s2200_s27 + $0x8] sm:$0xff] }
  0x90   :  { %1446 = vmatprep.subr.mxu0 %v1837_v3 }
  0x91   :  { %1447 = vmatpush3.msra.mxu0 %v459_v8 }
  0x92   :  { %1448 = vmatprep.subr.mxu0 %v1837_v3 }
  0x93   :  { %1449 = vmatpush3.msra.mxu0 %v458_v9 }
  0x94   :  { %1450 = vmatprep.subr.mxu0 %v1837_v3 }
  0x95   :  { %1451 = vmatpush3.msra.mxu0 %v457_v10  ;;  %v1112_v10 = vld [vmem:[#allocation17 + $0x78] sm:$0xff] }
  0x96   :  { %1452 = vmatprep.subr.mxu0 %v1837_v3 }
  0x97   :  { %1453 = vmatpush3.msra.mxu0 %v456_v11  ;;  %v1111_v11 = vld [vmem:[#allocation17 + $0x70] sm:$0xff] }
  0x98   :  { %1454 = vmatprep.subr.mxu0 %v1837_v3 }
  0x99   :  { %1455 = vmatpush3.msra.mxu0 %v455_v12  ;;  %v1110_v12 = vld [vmem:[#allocation17 + $0x68] sm:$0xff] }
  0x9a   :  { %1456 = vmatprep.subr.mxu0 %v1837_v3 }
  0x9b   :  { %1457 = vmatpush3.msra.mxu0 %v454_v13  ;;  %v1109_v13 = vld [vmem:[#allocation17 + $0x60] sm:$0xff] }
  0x9c   :  { %1458 = vmatprep.subr.mxu0 %v1837_v3 }
  0x9d   :  { %1459 = vmatpush3.msra.mxu0 %v453_v14  ;;  %v1108_v14 = vld [vmem:[#allocation17 + $0x58] sm:$0xff] }
  0x9e   :  { %1460 = vmatprep.subr.mxu0 %v1837_v3 }
  0x9f   :  { %1461 = vmatpush3.msra.mxu0 %v452_v15  ;;  %v1107_v15 = vld [vmem:[#allocation17 + $0x50] sm:$0xff] }
  0xa0   :  { %1462 = vmatprep.subr.mxu0 %v1837_v3 }
  0xa1   :  { %1463 = vmatpush3.msra.mxu0 %v451_v17  ;;  %v1106_v17 = vld [vmem:[#allocation17 + $0x48] sm:$0xff] }
  0xa2   :  { %1464 = vmatprep.subr.mxu0 %v1837_v3 }
  0xa3   :  { %1465 = vmatpush3.msra.mxu0 %v450_v18  ;;  %v1105_v18 = vld [vmem:[#allocation17 + $0x40] sm:$0xff] }
  0xa4   :  { %1466 = vmatprep.subr.mxu0 %v1837_v3 }
  0xa5   :  { %1467 = vmatpush3.msra.mxu0 %v449_v19  ;;  %v1104_v19 = vld [vmem:[#allocation17 + $0x38] sm:$0xff] }
  0xa6   :  { %1471 = vmatprep.subr.mxu0 %v1837_v3 }
 0x144   :  { %v353_v27 = vpop.f32.mrf.mxu0 }
 0x145   :  { %v354_v28 = vadd.f32 %v353_v27, %v259_v25  ;;  %v1099_v25 = vld [vmem:[#allocation17 + $0x10] sm:$0xff]  ;;  %v1097_v27 = vld [vmem:[#allocation17] sm:$0xff] }
 0x146   :  { %v355_v31 = vpop.f32.mrf.mxu0 }
 0x147   :  { %v1352_v29 = vmul.f32 -1.442695, %v354_v28  ;;  %v356_v32 = vadd.f32 %v355_v31, %v263_v30  ;;  %v424_v37 = vpop.f32.mrf.mxu1  ;;  %v732_v30 = vld [vmem:[%s2201_s20] sm:$0x3] }
 0x148   :  { %v425_v46 = vadd.f32 %v424_v37, %v267_v43 }
 0x149   :  { %1616 = vpow2.f32 %v1352_v29  ;;  %v1353_v33 = vmul.f32 -1.442695, %v356_v32  ;;  %v426_v41 = vpop.f32.mrf.mxu1 }
 0x14a   :  { %v427_v44 = vadd.f32 %v426_v41, %v271_v40 }
 0x14b   :  { %1618 = vpow2.f32 %v1353_v33  ;;  %v734_v33 = vrot.slane %v732_v30, 1 }
 0x156   :  { %v1617_v34 = vpop.eup %1616 }
 0x157   :  { %v432_v35 = vadd.f32 1.0, %v1617_v34 }
 0x158   :  { %v1619_v39 = vpop.eup %1618 }
 0x159   :  { %1620 = vrcp.f32 %v432_v35  ;;  %v438_v42 = vadd.f32 1.0, %v1619_v39 }
 0x15b   :  { %1622 = vrcp.f32 %v438_v42 }
 0x166   :  { %v1621_v45 = vpop.eup %1620 }
 0x167   :  { %v441_v47 = vmul.f32 %v1621_v45, %v427_v44  ;;  %v2075_v45 = vld [vmem:[#allocation5] sm:$0x3] }
 0x168   :  { %v1623_v49 = vpop.eup %1622 }
 0x169   :  { %v442_v48 = vadd.f32 %v441_v47, %v425_v46  ;;  %v444_v50 = vsub.f32 1.0, %v1623_v49  ;;  %v446_v53 = vmul.f32 %v1623_v49, %v1975_v16  ;;  %v554_v16 = vld [vmem:[%s2200_s27] sm:$0xff] }
 0x16a   :  { %1482 = vmatpush3.msra.mxu1 %v554_v16 }
 0x16b   :  { %1624 = vtanh.f32 %v442_v48  ;;  %1486 = vmatprep.subr.mxu1 %v1837_v3 }
 0x178   :  { %v1625_v51 = vpop.eup %1624 }
 0x179   :  { %v445_v52 = vmul.f32 %v1625_v51, %v444_v50 }
 0x17b   :  { %v447_v55 = vadd.f32 %v446_v53, %v445_v52 }
 0x17d   :  { %448 = vst [vmem:[#allocation2] sm:$0x3] %v447_v55  ;;  %1469 = vmatmul.mubr.f32.vlgmr.msra.gmra.mxu0 %v447_v55  ;;  %v543_v56 = vmul.f32 %v1354_v54, %v447_v55 }
 0x17e   :  { %1473 = vmatprep.mubr.msk.f32.mxu0 %vm1838_vm0, %v1837_v3  ;;  %1472 = vmatpush3.xpose.msra.mxu0 %v554_v16 }
 0x17f   :  { %v545_v57 = vsel %vm544_vm2, %v543_v56, 0.0  ;;  %1476 = vmatprep.subr.mxu0 %v1837_v3 }
 0x180   :  { %546 = vadd.xlane.f32.xlu0 %v545_v57 }
 0x184   :  { %v2023_v58 = vld [vmem:[#allocation2] sm:$0x3] }
 0x185   :  { %1262 = vst [vmem:[#allocation19] sm:$0x3] %v2023_v58 }
 0x209   :  { %v547_v60 = vpop.xlane.xlu0 %546 }
 0x20a   :  { %549 = vst.msk [vmem:[#allocation4] sm:$0x3] %vm548_vm1, %v547_v60 }
 0x211   :  { %v722_v61 = vld [vmem:[#allocation4] sm:$0x3] }
 0x212   :  { %725 = vperm.xlu0 %1614, %v722_v61   ;;  %v1003_v61 = vld [vmem:[#allocation14 + $0x78] sm:$0xff] }
 0x23d   :  { %v531_v0 = vpop.f32.mrf.mxu0 }
 0x23e   :  { %535 = vst [vmem:[#allocation3] sm:$0x3] %v531_v0  ;;  %v1000_v0 = vld [vmem:[#allocation14 + $0x60] sm:$0xff] }
 0x23f   :  { %v1470_v2 = vpop.f32.mrf.mxu0 }
 0x240   :  { %v998_v2 = vld [vmem:[#allocation14 + $0x50] sm:$0xff] }
 0x245   :  { %v1355_v5 = vld.sshfl [vmem:[#allocation3] sm:$0x11 pattern:$0x75316420] }
 0x246   :  { %v572_v6 = vrot.slane %v1355_v5, %v571_v4  ;;  %v565_v8 = vcombine.high %v1355_v5, %v1355_v5  ;;  %v996_v5 = vld [vmem:[#allocation14 + $0x40] sm:$0xff] }
 0x248   :  { %1474 = vmatmul.mubr.f32.vlgmr.msra.gmra.mxu0 %v572_v6  ;;  %v579_v9 = vrot.slane %v565_v8, %v571_v4  ;;  %v997_v4 = vld [vmem:[#allocation14 + $0x48] sm:$0xff]  ;;  %v995_v6 = vld [vmem:[#allocation14 + $0x38] sm:$0xff] }
 0x249   :  { %1477 = vmatpush3.xpose.msra.mxu0 %v2037_v7  ;;  %1478 = vmatprep.mubr.msk.f32.mxu0 %vm1838_vm0, %v1837_v3  ;;  %v993_v8 = vld [vmem:[#allocation14 + $0x28] sm:$0xff] }
 0x24a   :  { %1526 = vmatprep.subr.mxu0 %v1837_v3 }
 0x24c   :  { %1479 = vmatmul.mubr.f32.vlgmr.msra.gmra.mxu0 %v579_v9  ;;  %v992_v9 = vld [vmem:[#allocation14 + $0x20] sm:$0xff] }
 0x24d   :  { %1527 = vmatpush3.msra.mxu0 %v1112_v10  ;;  %1558 = vmatprep.mubr.msk.f32.mxu0 %vm1838_vm0, %v1837_v3  ;;  %v991_v10 = vld [vmem:[#allocation14 + $0x18] sm:$0xff] }
 0x24e   :  { %1528 = vmatprep.subr.mxu0 %v1837_v3 }
 0x24f   :  { %1529 = vmatpush3.msra.mxu0 %v1111_v11  ;;  %v990_v11 = vld [vmem:[#allocation14 + $0x10] sm:$0xff] }
 0x250   :  { %1530 = vmatprep.subr.mxu0 %v1837_v3 }
 0x251   :  { %1531 = vmatpush3.msra.mxu0 %v1110_v12  ;;  %v989_v12 = vld [vmem:[#allocation14 + $0x8] sm:$0xff] }
 0x252   :  { %1532 = vmatprep.subr.mxu0 %v1837_v3 }
 0x253   :  { %1533 = vmatpush3.msra.mxu0 %v1109_v13  ;;  %v768_v13 = vld [vmem:[#allocation6] sm:$0x3] }
 0x254   :  { %1534 = vmatprep.subr.mxu0 %v1837_v3 }
 0x255   :  { %1535 = vmatpush3.msra.mxu0 %v1108_v14 }
 0x256   :  { %1536 = vmatprep.subr.mxu0 %v1837_v3 }
 0x257   :  { %1537 = vmatpush3.msra.mxu0 %v1107_v15 }
 0x258   :  { %1538 = vmatprep.subr.mxu0 %v1837_v3 }
 0x259   :  { %1539 = vmatpush3.msra.mxu0 %v1106_v17 }
 0x25a   :  { %1540 = vmatprep.subr.mxu0 %v1837_v3 }
 0x25b   :  { %1541 = vmatpush3.msra.mxu0 %v1105_v18 }
 0x25c   :  { %1542 = vmatprep.subr.mxu0 %v1837_v3 }
 0x25d   :  { %1543 = vmatpush3.msra.mxu0 %v1104_v19  ;;  %v988_v19 = vld [vmem:[#allocation14] sm:$0xff] }
 0x25e   :  { %1544 = vmatprep.subr.mxu0 %v1837_v3 }
 0x25f   :  { %1545 = vmatpush3.msra.mxu0 %v1103_v20 }
 0x260   :  { %1546 = vmatprep.subr.mxu0 %v1837_v3 }
 0x261   :  { %1547 = vmatpush3.msra.mxu0 %v1102_v22 }
 0x262   :  { %1548 = vmatprep.subr.mxu0 %v1837_v3 }
 0x263   :  { %1549 = vmatpush3.msra.mxu0 %v1101_v23  ;;  %v2117_v23 = vand.u32 127, %v256_v21 }
 0x264   :  { %1550 = vmatprep.subr.mxu0 %v1837_v3 }
 0x265   :  { %1551 = vmatpush3.msra.mxu0 %v1100_v24 }
 0x266   :  { %1552 = vmatprep.subr.mxu0 %v1837_v3 }
 0x267   :  { %1553 = vmatpush3.msra.mxu0 %v1099_v25 }
 0x268   :  { %1554 = vmatprep.subr.mxu0 %v1837_v3 }
 0x269   :  { %1555 = vmatpush3.msra.mxu0 %v1098_v26 }
 0x26a   :  { %1556 = vmatprep.subr.mxu0 %v1837_v3 }
 0x26b   :  { %1557 = vmatpush3.msra.mxu0 %v1097_v27 }
 0x26c   :  { %1559 = vmatmul.mubr.f32.vlgmr.msra.gmra.mxu0 %v2023_v58 }
 0x28d   :  { %v726_v28 = vpop.permute.xlu0 %725 }
 0x28e   :  { %v727_v32 = vrot.slane %v726_v28, 1 }
 0x308   :  { %v648_v29 = vpop.f32.mrf.mxu0 }
 0x309   :  { %v730_v35 = vadd.f32 %v726_v28, %v648_v29 }
 0x30a   :  { %v1475_v31 = vpop.f32.mrf.mxu0 }
 0x30b   :  { %v2066_v39 = vadd.f32 %v732_v30, %v730_v35 }
 0x30c   :  { %v718_v34 = vpop.f32.mrf.mxu0 }
 0x30d   :  { %v731_v36 = vadd.f32 %v727_v32, %v718_v34  ;;  %v926_v32 = vld [vmem:[#allocation7] sm:$0x3] }
 0x30e   :  { %v1480_v37 = vpop.f32.mrf.mxu0 }
 0x30f   :  { %v2064_v38 = vadd.f32 %v734_v33, %v731_v36 }
 0x311   :  { %v741_v40 = vrot.slane %v2064_v38, 7 }
 0x313   :  { %v743_v41 = vsel %vm742_vm3, %v741_v40, %v2066_v39 }
 0x314   :  { %v748_v42 = vsel %vm745_vm4, %v743_v41, -inf  ;;  %746 = vst.msk [vmem:[#allocation21] sm:$0x3] %vm745_vm4, %v743_v41 }
 0x315   :  { %749 = vmax.xlane.f32.xlu1 %v748_v42 }
 0x32c   :  { %v2073_v43 = vpop.f32.mrf.mxu0 }
 0x32e   :  { %v1560_v44 = vpop.f32.mrf.mxu0 }
 0x32f   :  { %v1096_v44 = vld [vmem:[#allocation15 + $0x78] sm:$0xff] }
 0x39e   :  { %v2077_v46 = vpop.xlane.xlu1 %749 }
 0x39f   :  { %v751_v47 = vmax.f32 %v2075_v45, %v2077_v46  ;;  %v947_v22 = vrot.slane %v2077_v46, 1  ;;  %vm950_vm7 = vcmp.eq.f32.partialorder %v2066_v39, %v2077_v46  ;;  %vm971_vm9 = vcmp.gt.f32.partialorder %v2077_v46, %v2075_v45 }
 0x3a0   :  { %v952_v26 = vsel %vm950_vm7, %v2117_v23, 8 }
 0x3a1   :  { %757 = vperm.xlu1 %1615, %v751_v47   ;;  %v752_v48 = vsub.f32 %v2075_v45, %v751_v47  ;;  %940 = vst.msk [vmem:[#allocation5] sm:$0x3] %vm548_vm1, %v751_v47  ;;  %vm951_vm6 = vcmp.eq.f32.partialorder %v2064_v38, %v947_v22  ;;  %v1095_v47 = vld [vmem:[#allocation15 + $0x70] sm:$0xff] }
 0x3a2   :  { %v953_v24 = vsel %vm951_vm6, %v2117_v23, 8 }
 0x3a3   :  { %v753_v49 = vmul.f32 1.442695, %v752_v48  ;;  %v954_v25 = vrot.slane %v953_v24, 7  ;;  %v1094_v48 = vld [vmem:[#allocation15 + $0x68] sm:$0xff] }
 0x3a5   :  { %1626 = vpow2.f32 %v753_v49  ;;  %v955_v27 = vsel %vm742_vm3, %v954_v25, %v952_v26  ;;  %v1093_v49 = vld [vmem:[#allocation15 + $0x60] sm:$0xff] }
 0x3a6   :  { %v956_v28 = vsel %vm745_vm4, %v955_v27, 2147483647 }
 0x3a7   :  { %v958_v30 = vshra.s32 %v956_v28, 16 }
 0x3a9   :  { %v960_v35 = vcvt.s32.f32 %v958_v30 }
 0x3b2   :  { %v2083_v50 = vpop.eup %1626 }
 0x3b3   :  { %929 = vperm.xlu0 %1614, %v2083_v50   ;;  %v769_v14 = vmul.f32 %v2083_v50, %v768_v13  ;;  %v1092_v50 = vld [vmem:[#allocation15 + $0x58] sm:$0xff] }
 0x41c   :  { %v758_v51 = vpop.permute.xlu1 %757 }
 0x41d   :  { %v759_v52 = vrot.slane %v758_v51, 1  ;;  %v762_v53 = vsub.f32 %v2066_v39, %v758_v51  ;;  %v1091_v51 = vld [vmem:[#allocation15 + $0x50] sm:$0xff] }
 0x41f   :  { %v763_v54 = vsub.f32 %v2064_v38, %v759_v52  ;;  %v764_v55 = vmul.f32 1.442695, %v762_v53  ;;  %v1090_v52 = vld [vmem:[#allocation15 + $0x48] sm:$0xff]  ;;  %v1089_v53 = vld [vmem:[#allocation15 + $0x40] sm:$0xff] }
 0x421   :  { %1628 = vpow2.f32 %v764_v55  ;;  %v766_v56 = vmul.f32 1.442695, %v763_v54  ;;  %v1088_v54 = vld [vmem:[#allocation15 + $0x38] sm:$0xff]  ;;  %v1087_v55 = vld [vmem:[#allocation15 + $0x30] sm:$0xff] }
 0x423   :  { %1630 = vpow2.f32 %v766_v56  ;;  %v957_v56 = vand.u32 65535, %v956_v28 }
 0x42e   :  { %v1629_v57 = vpop.eup %1628  ;;  %v930_v33 = vpop.permute.xlu0 %929 }
 0x42f   :  { %1484 = vmatmul.mubr.msk.f32.vlgmr.msra.gmra.mxu1 %vm781_vm5, %v1629_v57  ;;  %v932_v36 = vmul.f32 %v930_v33, %v926_v32 }
 0x430   :  { %v1631_v58 = vpop.eup %1630  ;;  %1487 = vmatpush3.msra.mxu1 %v2037_v7  ;;  %1488 = vmatprep.mubr.msk.f32.mxu1 %vm1838_vm0, %v1837_v3  ;;  %v994_v7 = vld [vmem:[#allocation14 + $0x30] sm:$0xff] }
 0x431   :  { %v772_v59 = vrot.slane %v1631_v58, 7  ;;  %1491 = vmatprep.subr.mxu1 %v1837_v3 }
 0x433   :  { %1489 = vmatmul.mubr.msk.f32.vlgmr.msra.gmra.mxu1 %vm781_vm5, %v1631_v58  ;;  %v773_v16 = vsel %vm742_vm3, %v772_v59, %v1629_v57  ;;  %v959_v58 = vcvt.s32.f32 %v957_v56 }
 0x434   :  { %v775_v60 = vsel %vm745_vm4, %v773_v16, 0.0  ;;  %1523 = vmatprep.mubr.msk.f32.mxu1 %vm1838_vm0, %v1837_v3  ;;  %1492 = vmatpush3.msra.mxu1 %v1003_v61  ;;  %v1086_v16 = vld [vmem:[#allocation15 + $0x28] sm:$0xff]  ;;  %v1084_v61 = vld [vmem:[#allocation15 + $0x18] sm:$0xff] }
 0x435   :  { %776 = vadd.xlane.f32.xlu1 %v775_v60  ;;  %1493 = vmatprep.subr.mxu1 %v1837_v3  ;;  %v1085_v60 = vld [vmem:[#allocation15 + $0x20] sm:$0xff] }
 0x436   :  { %1494 = vmatpush3.msra.mxu1 %v1002_v62  ;;  %v1083_v62 = vld [vmem:[#allocation15 + $0x10] sm:$0xff] }
 0x437   :  { %1495 = vmatprep.subr.mxu1 %v1837_v3 }
 0x438   :  { %1496 = vmatpush3.msra.mxu1 %v1001_v63  ;;  %v1082_v63 = vld [vmem:[#allocation15 + $0x8] sm:$0xff] }
 0x439   :  { %1497 = vmatprep.subr.mxu1 %v1837_v3 }
 0x43a   :  { %1498 = vmatpush3.msra.mxu1 %v1000_v0  ;;  %v1081_v0 = vld [vmem:[#allocation15] sm:$0xff] }
 0x43b   :  { %1499 = vmatprep.subr.mxu1 %v1837_v3 }
 0x43c   :  { %1500 = vmatpush3.msra.mxu1 %v999_v1 }
 0x43d   :  { %1501 = vmatprep.subr.mxu1 %v1837_v3 }
 0x43e   :  { %1502 = vmatpush3.msra.mxu1 %v998_v2 }
 0x43f   :  { %1503 = vmatprep.subr.mxu1 %v1837_v3 }
 0x440   :  { %1504 = vmatpush3.msra.mxu1 %v997_v4 }
 0x441   :  { %1505 = vmatprep.subr.mxu1 %v1837_v3 }
 0x442   :  { %1506 = vmatpush3.msra.mxu1 %v996_v5 }
 0x443   :  { %1507 = vmatprep.subr.mxu1 %v1837_v3 }
 0x444   :  { %1508 = vmatpush3.msra.mxu1 %v995_v6 }
 0x445   :  { %1509 = vmatprep.subr.mxu1 %v1837_v3 }
 0x446   :  { %1510 = vmatpush3.msra.mxu1 %v994_v7  ;;  %v972_v7 = vld [vmem:[#allocation8] sm:$0x3] }
 0x447   :  { %1511 = vmatprep.subr.mxu1 %v1837_v3 }
 0x448   :  { %1512 = vmatpush3.msra.mxu1 %v993_v8 }
 0x449   :  { %1513 = vmatprep.subr.mxu1 %v1837_v3 }
 0x44a   :  { %1514 = vmatpush3.msra.mxu1 %v992_v9 }
 0x44b   :  { %1515 = vmatprep.subr.mxu1 %v1837_v3 }
 0x44c   :  { %1516 = vmatpush3.msra.mxu1 %v991_v10 }
 0x44d   :  { %1517 = vmatprep.subr.mxu1 %v1837_v3 }
 0x44e   :  { %1518 = vmatpush3.msra.mxu1 %v990_v11 }
 0x44f   :  { %1519 = vmatprep.subr.mxu1 %v1837_v3 }
 0x450   :  { %1520 = vmatpush3.msra.mxu1 %v989_v12 }
 0x451   :  { %1521 = vmatprep.subr.mxu1 %v1837_v3 }
 0x452   :  { %1522 = vmatpush3.msra.mxu1 %v988_v19 }
 0x453   :  { %1561 = vmatprep.subr.mxu1 %v1837_v3 }
 0x4be   :  { %v777_v15 = vpop.xlane.xlu1 %776 }
 0x4bf   :  { %v778_v17 = vadd.f32 %v777_v15, %v769_v14 }
 0x4c1   :  { %780 = vst.msk [vmem:[#allocation6] sm:$0x3] %vm548_vm1, %v778_v17 }
 0x4c8   :  { %v980_v18 = vld [vmem:[#allocation6] sm:$0x3] }
 0x4c9   :  { %1632 = vrcp.f32 %v980_v18  ;;  %v1263_v6 = vld [vmem:[#allocation6] sm:$0x3] }
 0x4ca   :  { %1634 = vrcp.f32 %v1263_v6 }
 0x4d6   :  { %v1633_v20 = vpop.eup %1632 }
 0x4d7   :  { %984 = vperm.xlu0 %1614, %v1633_v20   ;;  %v1635_v14 = vpop.eup %1634 }
 0x4ef   :  { %v850_v29 = vpop.f32.mrf.mxu1 }
 0x4f1   :  { %v1485_v31 = vpop.f32.mrf.mxu1 }
 0x4f3   :  { %v922_v34 = vpop.f32.mrf.mxu1 }
 0x4f4   :  { %v935_v21 = vrot.slane %v922_v34, 7 }
 0x4f5   :  { %v1490_v37 = vpop.f32.mrf.mxu1 }
 0x4f6   :  { %v936_v38 = vsel %vm742_vm3, %v935_v21, %v850_v29  ;;  %961 = vmin.xlane.f32.xlu0 %v960_v35 }
 0x4f7   :  { %v938_v39 = vadd.f32 %v936_v38, %v932_v36 }
 0x4f9   :  { %939 = vst [vmem:[#allocation7] sm:$0x3] %v938_v39 }
 0x500   :  { %v979_v40 = vld [vmem:[#allocation7] sm:$0x3] }
 0x552   :  { %v985_v41 = vpop.permute.xlu0 %984 }
 0x553   :  { %v987_v42 = vmul.f32 %v985_v41, %v979_v40 }
 0x555   :  { %1524 = vmatmul.mubr.f32.vlgmr.msra.gmra.mxu1 %v987_v42 }
 0x556   :  { %1562 = vmatpush3.msra.mxu1 %v1096_v44  ;;  %1593 = vmatprep.mubr.msk.f32.mxu1 %vm1838_vm0, %v1837_v3 }
 0x557   :  { %1563 = vmatprep.subr.mxu1 %v1837_v3 }
 0x558   :  { %1564 = vmatpush3.msra.mxu1 %v1095_v47 }
 0x559   :  { %1565 = vmatprep.subr.mxu1 %v1837_v3 }
 0x55a   :  { %1566 = vmatpush3.msra.mxu1 %v1094_v48 }
 0x55b   :  { %1567 = vmatprep.subr.mxu1 %v1837_v3 }
 0x55c   :  { %1568 = vmatpush3.msra.mxu1 %v1093_v49 }
 0x55d   :  { %1569 = vmatprep.subr.mxu1 %v1837_v3 }
 0x55e   :  { %1570 = vmatpush3.msra.mxu1 %v1092_v50 }
 0x55f   :  { %1571 = vmatprep.subr.mxu1 %v1837_v3 }
 0x560   :  { %1572 = vmatpush3.msra.mxu1 %v1091_v51 }
 0x561   :  { %1573 = vmatprep.subr.mxu1 %v1837_v3 }
 0x562   :  { %1574 = vmatpush3.msra.mxu1 %v1090_v52 }
 0x563   :  { %1575 = vmatprep.subr.mxu1 %v1837_v3 }
 0x564   :  { %1576 = vmatpush3.msra.mxu1 %v1089_v53 }
 0x565   :  { %1577 = vmatprep.subr.mxu1 %v1837_v3 }
 0x566   :  { %1578 = vmatpush3.msra.mxu1 %v1088_v54 }
 0x567   :  { %1579 = vmatprep.subr.mxu1 %v1837_v3 }
 0x568   :  { %1580 = vmatpush3.msra.mxu1 %v1087_v55 }
 0x569   :  { %1581 = vmatprep.subr.mxu1 %v1837_v3 }
 0x56a   :  { %1582 = vmatpush3.msra.mxu1 %v1086_v16 }
 0x56b   :  { %1583 = vmatprep.subr.mxu1 %v1837_v3 }
 0x56c   :  { %1584 = vmatpush3.msra.mxu1 %v1085_v60 }
 0x56d   :  { %1585 = vmatprep.subr.mxu1 %v1837_v3 }
 0x56e   :  { %1586 = vmatpush3.msra.mxu1 %v1084_v61 }
 0x56f   :  { %1587 = vmatprep.subr.mxu1 %v1837_v3 }
 0x570   :  { %1588 = vmatpush3.msra.mxu1 %v1083_v62 }
 0x571   :  { %1589 = vmatprep.subr.mxu1 %v1837_v3 }
 0x572   :  { %1590 = vmatpush3.msra.mxu1 %v1082_v63 }
 0x573   :  { %1591 = vmatprep.subr.mxu1 %v1837_v3  ;;  %v1358_v3 = vld [vmem:[%s2185_s9] ss:$0 sm:$0xff] }
 0x574   :  { %1592 = vmatpush3.msra.mxu1 %v1081_v0 }
 0x57f   :  { %v962_v57 = vpop.xlane.xlu0 %961 }
 0x580   :  { %vm963_vm8 = vcmp.eq.f32.partialorder %v960_v35, %v962_v57  ;;  %v968_v1 = vcvt.f32.s32 %v962_v57 }
 0x581   :  { %v964_v59 = vsel %vm963_vm8, %v959_v58, inf }
 0x582   :  { %965 = vmin.xlane.f32.xlu1 %v964_v59  ;;  %v969_v4 = vshll.u32 %v968_v1, 16 }
 0x60b   :  { %v966_v2 = vpop.xlane.xlu1 %965 }
 0x60c   :  { %v967_v5 = vcvt.f32.s32 %v966_v2 }
 0x60e   :  { %v970_v8 = vadd.s32 %v969_v4, %v967_v5 }
 0x610   :  { %v973_v9 = vsel %vm971_vm9, %v970_v8, %v972_v7 }
 0x611   :  { %974 = vst.msk [vmem:[#allocation8] sm:$0x3] %vm548_vm1, %v973_v9 }
 0x615   :  { %v1077_v10 = vpop.f32.mrf.mxu1 }
 0x616   :  { %v1078_v11 = vadd.f32 %v1358_v3, %v1077_v10 }
 0x617   :  { %v1525_v12 = vpop.f32.mrf.mxu1 }
 0x618   :  { %1594 = vmatmul.mubr.f32.vlgmr.msra.gmra.mxu1 %v1078_v11  ;;  %v1277_v13 = vld [vmem:[#allocation8] sm:$0x3] }
 0x619   :  { %1279 = vperm.xlu1 %1615, %v1277_v13   ;;  %v1272_v15 = vld [vmem:[#allocation8] sm:$0x3] }
 0x61d   :  { %1268 = vperm.xlu1 %1615, %v1635_v14  }
 0x621   :  { %1274 = vperm.xlu1 %1615, %v1272_v15  }
 0x622   :  { %1747 = shalt.err (!%p1744_p1)
}
 0x623   :  { %1304 = dma.vmem_to_hbm [thread:$0]  %s1302_s23, 32, %s2190_s14, [#allocation20]  }
 0x624   :  { %s1843_s24 = smov [#allocation21]  }
 0x625   :  { %s1311_s8 = sshll.u32 %s1843_s24, 4  ;;  %s1312_s8 = int_to_ptr.vmem [resolvable:$true] %s1311_s8 }
 0x626   :  { %s1756_s11 = scalar_lea.vmem %s1312_s8, 32  ;;  %p1761_p3 = scmp.lt.s32.totalorder %s1312_s8, %s1312_s8 }
 0x627   :  { %p1757_p2 = scmp.ne.s32.totalorder %s1312_s8, %s1756_s11  ;;  %p1762_p4 = scmp.lt.s32.totalorder %s1756_s11, %s1756_s11 }
 0x629   :  { %p1763_p5 = por %p1762_p4, %p1761_p3 }
 0x62b   :  { %p1764_p6 = pnand %p1763_p5, %p1757_p2 }
 0x62d   :  { %1767 = shalt.err (!%p1764_p6)
}
 0x62e   :  { %1314 = dma.vmem_to_hbm [thread:$0]  %s1312_s8, 32, %s2191_s15, [#allocation20]   ;;  %v1282_v45 = vld [vmem:[%s2179_s3] sm:$0x3] }
 0x62f   :  { %s1844_s25 = smov [#allocation22]  }
 0x630   :  { %s1321_s5 = sshll.u32 %s1844_s25, 4  ;;  %s1322_s5 = int_to_ptr.vmem [resolvable:$true] %s1321_s5 }
 0x631   :  { %s1776_s14 = scalar_lea.vmem %s1322_s5, 32  ;;  %p1781_p8 = scmp.lt.s32.totalorder %s1322_s5, %s1322_s5 }
 0x632   :  { %p1777_p7 = scmp.ne.s32.totalorder %s1322_s5, %s1776_s14  ;;  %p1782_p9 = scmp.lt.s32.totalorder %s1776_s14, %s1776_s14 }
 0x634   :  { %p1783_p10 = por %p1782_p9, %p1781_p8 }
 0x636   :  { %p1784_p11 = pnand %p1783_p10, %p1777_p7 }
 0x694   :  { %v1280_v46 = vpop.permute.xlu1 %1279 }
 0x695   :  { %vm1281_vm10 = vcmp.eq.s32.totalorder %v2117_v23, %v1280_v46 }
 0x696   :  { %v1283_v17 = vsel %vm1281_vm10, -1e+10, %v1282_v45 }
 0x697   :  { %1284 = vst.msk [vmem:[#allocation22] sm:$0x3] %vm745_vm4, %v1283_v17 }
 0x698   :  { %v1269_v18 = vpop.permute.xlu1 %1268 }
 0x699   :  { %1787 = shalt.err (!%p1784_p11)
}
 0x69a   :  { %1324 = dma.vmem_to_hbm [thread:$0]  %s1322_s5, 32, %s2192_s16, [#allocation23]   ;;  %1271 = vst [vmem:[%s2193_s17] sm:$0x3] %v1269_v18  ;;  %v1359_v22 = vld [vmem:[%s2188_s12] ss:$0 sm:$0xff] }
 0x69b   :  { %s1845_s20 = smov [#allocation18]  }
 0x69c   :  { %v1275_v19 = vpop.permute.xlu1 %1274  ;;  %s1291_s22 = sshll.u32 %s1845_s20, 4  ;;  %s1292_s22 = int_to_ptr.vmem [resolvable:$true] %s1291_s22 }
 0x69d   :  { %1276 = vst [vmem:[%s2194_s18] sm:$0x3] %v1275_v19  ;;  %s1796_s16 = scalar_lea.vmem %s1292_s22, 32  ;;  %p1801_p13 = scmp.lt.s32.totalorder %s1292_s22, %s1292_s22 }
 0x69e   :  { %p1797_p12 = scmp.ne.s32.totalorder %s1292_s22, %s1796_s16  ;;  %p1802_p0 = scmp.lt.s32.totalorder %s1796_s16, %s1796_s16 }
 0x6a0   :  { %p1803_p1 = por %p1802_p0, %p1801_p13 }
 0x6a2   :  { %p1804_p2 = pnand %p1803_p1, %p1797_p12 }
 0x6d8   :  { %v1249_v20 = vpop.f32.mrf.mxu1 }
 0x6d9   :  { %v1250_v23 = vadd.f32 %v1249_v20, %v2073_v43 }
 0x6da   :  { %v1595_v24 = vpop.f32.mrf.mxu1 }
 0x6db   :  { %v1260_v25 = vadd.f32 %v1359_v22, %v1250_v23 }
 0x6dd   :  { %1261 = vst [vmem:[#allocation18] sm:$0x3] %v1260_v25 }
 0x6de   :  { %1807 = shalt.err (!%p1804_p2)
}
 0x6df   :  { %1294 = dma.vmem_to_hbm [thread:$0]  %s1292_s22, 32, %s2189_s13, [#allocation11]  }
 0x6e0   :  { %1822 = dma.done.wait [#allocation11], 32  }
 0x6e1   :  { %1823 = vsyncadd [#allocation11], 4294967264 }
 0x6e2   :  { %1824 = dma.done.wait [#allocation20], 64  }
 0x6e3   :  { %1825 = vsyncadd [#allocation20], 4294967232 }
 0x6e4   :  { %1826 = dma.done.wait [#allocation23], 32  }
 0x6e5   :  { %1827 = vsyncadd [#allocation23], 4294967264 }
 0x6e6   :  { %1345 = vsyncpa [#allocation10], 1 }
 0x6e7   :  { %1346 = vsyncpa [#allocation13], 1 }
 0x6e8   :  { %1347 = vsyncpa [#allocation16], 1 }
 0x6e9   :  { %1348 = vsyncpa [#allocation11], 1 }
 0x6ea   :  { %1349 = vsyncpa [#allocation20], 1 }
 0x6eb   :  { %1350 = vsyncpa [#allocation23], 1 }

</bundles_post_ra>
